<compile_context>
chip_gen: v7x
topology: tpu7x:2x2x1
jax: 0.10.0
libtpu: 0.0.40
codegen_flags: <defaults>
</compile_context>

<pallas_src>
import functools

import jax
import jax.numpy as jnp
from jax.experimental import pallas as pl
from jax.experimental.pallas import tpu as pltpu

EPS = 1e-5


def _round_up(x, m):
    return (x + m - 1) // m * m


# ---------------------------------------------------------------------------
# Pallas kernel: fused conv(kxk) + folded-BN shift [+ residual] [+ ReLU]
# ---------------------------------------------------------------------------
def _conv_bn_kernel(*refs, ksize, stride, ho, wo, relu, has_res):
    if has_res:
        x_ref, w_ref, shift_ref, res_ref, o_ref = refs
    else:
        x_ref, w_ref, shift_ref, o_ref = refs
        res_ref = None

    tb = o_ref.shape[0]            # images per grid step
    cin = x_ref.shape[-1]
    cout = o_ref.shape[-1]         # padded to a multiple of 128
    m = tb * ho * wo

    # k*k accumulated MXU matmuls over shifted windows (in-VMEM, no im2col).
    acc = jnp.zeros((m, cout), jnp.float32)
    for dy in range(ksize):
        for dx in range(ksize):
            tap = dy * ksize + dx
            phase = (dy % stride) * stride + (dx % stride)
            r0 = dy // stride
            c0 = dx // stride
            xs = x_ref[:, phase, r0:r0 + ho, c0:c0 + wo, :]     # (tb, ho, wo, cin)
            acc = acc + jnp.dot(xs.reshape(m, cin), w_ref[tap],
                                preferred_element_type=jnp.float32)

    out = acc + shift_ref[...]                                   # (1, cout) broadcast
    out = out.reshape(tb, ho * wo, cout)
    if res_ref is not None:
        out = out + res_ref[...]
    if relu:
        out = jnp.maximum(out, 0.0)
    o_ref[...] = out.astype(o_ref.dtype)


def _pick_batch_tile(n, rows_per_image, target_rows=512):
    """Largest divisor of n that keeps ~target_rows matmul rows per grid step
    while leaving >= 2 grid steps (megacore) when the batch allows it."""
    target = max(1, target_rows // max(1, rows_per_image))
    best = 1
    for d in range(1, n + 1):
        if n % d or d > target:
            continue
        if n >= 2 and n // d < 2:
            continue
        best = d
    return best


def conv_bn_act(x_nhwc, w_oihw, gamma, beta, mean, var, *, stride, ksize, pad,
                relu, residual=None, out_dtype=jnp.float32):
    """Fused conv(kxk, stride, pad) + eval-mode BN [+ residual] [+ ReLU].

    Returns (out, Ho, Wo, Cp) with out shaped (N, Ho*Wo, Cp); the trailing
    Cp - Cout channels are exactly zero.
    """
    N, H, W, Cin = x_nhwc.shape
    Cout, Cin_w, kh, kw = w_oihw.shape
    assert (Cin_w, kh, kw) == (Cin, ksize, ksize)

    Ho = (H + 2 * pad - ksize) // stride + 1
    Wo = (W + 2 * pad - ksize) // stride + 1
    Cp = _round_up(Cout, 128)              # lane-dense output channels

    # ---- fold BN scale into the weights; only the shift goes to the kernel.
    scale = gamma / jnp.sqrt(var + EPS)
    shift = beta - mean * scale
    w = jnp.transpose(w_oihw, (2, 3, 1, 0)).reshape(ksize * ksize, Cin, Cout)
    w = w * scale[None, None, :]
    w = jnp.pad(w, ((0, 0), (0, 0), (0, Cp - Cout))).astype(jnp.bfloat16)
    shift = jnp.pad(shift, (0, Cp - Cout)).reshape(1, Cp).astype(jnp.float32)

    # ---- phase split of the zero-padded input (pure permutation, no 9x blowup)
    #   xph[n, py*stride+px, a, b, c] == xpad[n, a*stride+py, b*stride+px, c]
    # so tap (dy, dx) is the contiguous slice
    #   xph[:, (dy%s)*s+(dx%s), dy//s : dy//s+Ho, dx//s : dx//s+Wo, :]
    Hs = Ho + (ksize - 1) // stride
    Ws = Wo + (ksize - 1) // stride
    xpad = jnp.pad(
        x_nhwc.astype(jnp.bfloat16),
        ((0, 0), (pad, Hs * stride - H - pad), (pad, Ws * stride - W - pad), (0, 0)))
    xph = xpad.reshape(N, Hs, stride, Ws, stride, Cin)
    xph = xph.transpose(0, 2, 4, 1, 3, 5).reshape(N, stride * stride, Hs, Ws, Cin)

    tb = _pick_batch_tile(N, Ho * Wo)
    grid = (N // tb,)

    in_specs = [
        pl.BlockSpec((tb, stride * stride, Hs, Ws, Cin),
                     lambda i: (i, 0, 0, 0, 0)),
        pl.BlockSpec((ksize * ksize, Cin, Cp), lambda i: (0, 0, 0)),
        pl.BlockSpec((1, Cp), lambda i: (0, 0)),
    ]
    args = [xph, w, shift]
    io_aliases = {}
    if residual is not None:
        in_specs.append(pl.BlockSpec((tb, Ho * Wo, Cp), lambda i: (i, 0, 0)))
        args.append(residual)
        io_aliases = {3: 0}        # reuse the residual's HBM buffer for the output

    kernel = functools.partial(
        _conv_bn_kernel, ksize=ksize, stride=stride, ho=Ho, wo=Wo,
        relu=relu, has_res=residual is not None)

    out = pl.pallas_call(
        kernel,
        out_shape=jax.ShapeDtypeStruct((N, Ho * Wo, Cp), out_dtype),
        grid=grid,
        in_specs=in_specs,
        out_specs=pl.BlockSpec((tb, Ho * Wo, Cp), lambda i: (i, 0, 0)),
        input_output_aliases=io_aliases,
        compiler_params=pltpu.CompilerParams(
            dimension_semantics=("parallel",),
            vmem_limit_bytes=32 * 1024 * 1024),
    )(*args)
    return out, Ho, Wo, Cp


# ---------------------------------------------------------------------------
# BasicBlock: parameter init + forward
# ---------------------------------------------------------------------------
def init_basic_block(key, cin, cout, stride):
    ks = jax.random.split(key, 12)
    params = {
        "w1": jax.random.normal(ks[0], (cout, cin, 3, 3), jnp.float32) * 0.1,
        "g1": 1.0 + 0.1 * jax.random.normal(ks[1], (cout,), jnp.float32),
        "b1": 0.1 * jax.random.normal(ks[2], (cout,), jnp.float32),
        "m1": 0.1 * jax.random.normal(ks[3], (cout,), jnp.float32),
        "v1": jax.random.uniform(ks[4], (cout,), jnp.float32, 0.5, 1.5),
        "w2": jax.random.normal(ks[5], (cout, cout, 3, 3), jnp.float32) * 0.1,
        "g2": 1.0 + 0.1 * jax.random.normal(ks[6], (cout,), jnp.float32),
        "b2": 0.1 * jax.random.normal(ks[7], (cout,), jnp.float32),
        "m2": 0.1 * jax.random.normal(ks[8], (cout,), jnp.float32),
        "v2": jax.random.uniform(ks[9], (cout,), jnp.float32, 0.5, 1.5),
    }
    if stride != 1 or cin != cout:
        kd = jax.random.split(ks[10], 6)
        params.update({
            "wd": jax.random.normal(kd[0], (cout, cin, 1, 1), jnp.float32) * 0.1,
            "gd": 1.0 + 0.1 * jax.random.normal(kd[1], (cout,), jnp.float32),
            "bd": 0.1 * jax.random.normal(kd[2], (cout,), jnp.float32),
            "md": 0.1 * jax.random.normal(kd[3], (cout,), jnp.float32),
            "vd": jax.random.uniform(kd[4], (cout,), jnp.float32, 0.5, 1.5),
        })
    return params


def basic_block_forward(x_nchw, params, stride):
    # TODO(synk): BatchNorm is implemented in eval mode (running stats folded
    # into the conv); training-mode batch statistics are not computed here.
    x = jnp.transpose(x_nchw, (0, 2, 3, 1)).astype(jnp.float32)   # NCHW -> NHWC
    N, H, W, Cin = x.shape
    Cout = params["w1"].shape[0]

    # ---- conv1 + bn1 + relu (Pallas); keep activations in bf16 for conv2 ----
    out1, Ho, Wo, Cp = conv_bn_act(
        x, params["w1"], params["g1"], params["b1"], params["m1"], params["v1"],
        stride=stride, ksize=3, pad=1, relu=True, out_dtype=jnp.bfloat16)

    # ---- residual branch (f32) ----
    if "wd" in params:
        # 1x1/stride conv == plain matmul on the spatially subsampled input.
        xs = x[:, ::stride, ::stride, :]
        residual, _, _, _ = conv_bn_act(
            xs, params["wd"], params["gd"], params["bd"], params["md"], params["vd"],
            stride=1, ksize=1, pad=0, relu=False, out_dtype=jnp.float32)
    else:
        residual = jnp.pad(x.reshape(N, H * W, Cin),
                           ((0, 0), (0, 0), (0, Cp - Cin)))

    # ---- conv2 + bn2 + residual add + relu (single fused Pallas kernel) ----
    out1_nhwc = out1.reshape(N, Ho, Wo, Cp)                # padded channels are 0
    w2 = jnp.pad(params["w2"], ((0, 0), (0, Cp - Cout), (0, 0), (0, 0)))
    out2, _, _, _ = conv_bn_act(
        out1_nhwc, w2, params["g2"], params["b2"], params["m2"], params["v2"],
        stride=1, ksize=3, pad=1, relu=True, residual=residual,
        out_dtype=jnp.float32)

    out = out2[:, :, :Cout].reshape(N, Ho, Wo, Cout)
    return jnp.transpose(out, (0, 3, 1, 2))                # NHWC -> NCHW


# ---------------------------------------------------------------------------
# Pure-JAX reference (XLA convs, f32 HIGHEST) for correctness check
# ---------------------------------------------------------------------------
def reference_forward(x_nchw, params, stride):
    def conv(x, w, s, pad):
        return jax.lax.conv_general_dilated(
            x, w, (s, s), [(pad, pad), (pad, pad)],
            dimension_numbers=("NCHW", "OIHW", "NCHW"),
            precision=jax.lax.Precision.HIGHEST,
        )

    def bn(x, g, b, m, v):
        g, b, m, v = (t[None, :, None, None] for t in (g, b, m, v))
        return (x - m) / jnp.sqrt(v + EPS) * g + b

    out = jnp.maximum(
        bn(conv(x_nchw, params["w1"], stride, 1),
           params["g1"], params["b1"], params["m1"], params["v1"]), 0.0)
    out = bn(conv(out, params["w2"], 1, 1),
             params["g2"], params["b2"], params["m2"], params["v2"])
    if "wd" in params:
        res = bn(conv(x_nchw, params["wd"], stride, 0),
                 params["gd"], params["bd"], params["md"], params["vd"])
    else:
        res = x_nchw
    return jnp.maximum(out + res, 0.0)


if __name__ == "__main__":
    key = jax.random.PRNGKey(0)
    k_x, k_p = jax.random.split(key)

    N, Cin, Cout, H, W, stride = 2, 4, 8, 16, 16, 2
    x = jax.random.normal(k_x, (N, Cin, H, W), jnp.float32)
    params = init_basic_block(k_p, Cin, Cout, stride)

    fwd = jax.jit(basic_block_forward, static_argnums=2)
    out = jax.block_until_ready(fwd(x, params, stride))

    ref = jax.block_until_ready(reference_forward(x, params, stride))
    assert out.shape == ref.shape, (out.shape, ref.shape)
    # Kernel runs the convs with bf16 operands on the MXU (f32 accumulate);
    # the reference is f32/HIGHEST, so allow bf16-level tolerance.
    max_err = float(jnp.max(jnp.abs(out - ref)))
    assert jnp.allclose(out, ref, rtol=3e-2, atol=3e-2), max_err

    print("KERNEL_OK")
</pallas_src>

<mosaic_0001>
module attributes {stable_mosaic.version = 11 : i64} {
  func.func @_conv_bn_kernel(%arg0: i32, %arg1: memref<1x4x9x9x4xbf16, #tpu.memory_space<vmem>>, %arg2: memref<9x4x128xbf16, #tpu.memory_space<vmem>>, %arg3: memref<1x128xf32, #tpu.memory_space<vmem>>, %arg4: memref<1x64x128xbf16, #tpu.memory_space<vmem>>) attributes {dimension_semantics = [#tpu.dimension_semantics<parallel>], iteration_bounds = array<i64: 2>, scalar_prefetch = 0 : i64, scratch_operands = 0 : i64, tpu.core_type = #tpu.core_type<tc>, window_params = [{transform_indices = @transform_0, window_bounds = array<i64: 1, 4, 9, 9, 4>}, {pipeline_mode = #tpu.pipeline_mode<synchronous>, transform_indices = @transform_1, window_bounds = array<i64: 9, 4, 128>}, {pipeline_mode = #tpu.pipeline_mode<synchronous>, transform_indices = @transform_2, window_bounds = array<i64: 1, 128>}, {transform_indices = @transform_3, window_bounds = array<i64: 1, 64, 128>}]} {
    %cst = arith.constant 0.000000e+00 : f32
    %0 = vector.broadcast %cst : f32 to vector<64x128xf32>
    %c0 = arith.constant 0 : index
    %c0_0 = arith.constant 0 : index
    %c0_1 = arith.constant 0 : index
    %c0_2 = arith.constant 0 : index
    %c0_3 = arith.constant 0 : index
    %1 = vector.load %arg1[%c0, %c0_0, %c0_1, %c0_2, %c0_3] : memref<1x4x9x9x4xbf16, #tpu.memory_space<vmem>>, vector<1x1x8x8x4xbf16>
    %2 = vector.shape_cast %1 : vector<1x1x8x8x4xbf16> to vector<1x8x8x4xbf16>
    %3 = vector.shape_cast %2 : vector<1x8x8x4xbf16> to vector<64x4xbf16>
    %c0_4 = arith.constant 0 : index
    %c0_5 = arith.constant 0 : index
    %c0_6 = arith.constant 0 : index
    %4 = vector.load %arg2[%c0_4, %c0_5, %c0_6] : memref<9x4x128xbf16, #tpu.memory_space<vmem>>, vector<1x4x128xbf16>
    %5 = vector.shape_cast %4 : vector<1x4x128xbf16> to vector<4x128xbf16>
    %cst_7 = arith.constant dense<0.000000e+00> : vector<64x128xf32>
    %6 = tpu.matmul %3, %5, %cst_7 {dimension_numbers = #tpu.dot_dimension_numbers<[1], [0], [0], [1], [0, 0, 1, 1], [], []>} : vector<64x4xbf16>, vector<4x128xbf16>, vector<64x128xf32> -> vector<64x128xf32>
    %7 = arith.addf %0, %6 : vector<64x128xf32>
    %c0_8 = arith.constant 0 : index
    %c1 = arith.constant 1 : index
    %c0_9 = arith.constant 0 : index
    %c0_10 = arith.constant 0 : index
    %c0_11 = arith.constant 0 : index
    %8 = vector.load %arg1[%c0_8, %c1, %c0_9, %c0_10, %c0_11] : memref<1x4x9x9x4xbf16, #tpu.memory_space<vmem>>, vector<1x1x8x8x4xbf16>
    %9 = vector.shape_cast %8 : vector<1x1x8x8x4xbf16> to vector<1x8x8x4xbf16>
    %10 = vector.shape_cast %9 : vector<1x8x8x4xbf16> to vector<64x4xbf16>
    %c1_12 = arith.constant 1 : index
    %c0_13 = arith.constant 0 : index
    %c0_14 = arith.constant 0 : index
    %11 = vector.load %arg2[%c1_12, %c0_13, %c0_14] : memref<9x4x128xbf16, #tpu.memory_space<vmem>>, vector<1x4x128xbf16>
    %12 = vector.shape_cast %11 : vector<1x4x128xbf16> to vector<4x128xbf16>
    %cst_15 = arith.constant dense<0.000000e+00> : vector<64x128xf32>
    %13 = tpu.matmul %10, %12, %cst_15 {dimension_numbers = #tpu.dot_dimension_numbers<[1], [0], [0], [1], [0, 0, 1, 1], [], []>} : vector<64x4xbf16>, vector<4x128xbf16>, vector<64x128xf32> -> vector<64x128xf32>
    %14 = arith.addf %7, %13 : vector<64x128xf32>
    %c0_16 = arith.constant 0 : index
    %c0_17 = arith.constant 0 : index
    %c0_18 = arith.constant 0 : index
    %c1_19 = arith.constant 1 : index
    %c0_20 = arith.constant 0 : index
    %15 = vector.load %arg1[%c0_16, %c0_17, %c0_18, %c1_19, %c0_20] : memref<1x4x9x9x4xbf16, #tpu.memory_space<vmem>>, vector<1x1x8x8x4xbf16>
    %16 = vector.shape_cast %15 : vector<1x1x8x8x4xbf16> to vector<1x8x8x4xbf16>
    %17 = vector.shape_cast %16 : vector<1x8x8x4xbf16> to vector<64x4xbf16>
    %c2 = arith.constant 2 : index
    %c0_21 = arith.constant 0 : index
    %c0_22 = arith.constant 0 : index
    %18 = vector.load %arg2[%c2, %c0_21, %c0_22] : memref<9x4x128xbf16, #tpu.memory_space<vmem>>, vector<1x4x128xbf16>
    %19 = vector.shape_cast %18 : vector<1x4x128xbf16> to vector<4x128xbf16>
    %cst_23 = arith.constant dense<0.000000e+00> : vector<64x128xf32>
    %20 = tpu.matmul %17, %19, %cst_23 {dimension_numbers = #tpu.dot_dimension_numbers<[1], [0], [0], [1], [0, 0, 1, 1], [], []>} : vector<64x4xbf16>, vector<4x128xbf16>, vector<64x128xf32> -> vector<64x128xf32>
    %21 = arith.addf %14, %20 : vector<64x128xf32>
    %c0_24 = arith.constant 0 : index
    %c2_25 = arith.constant 2 : index
    %c0_26 = arith.constant 0 : index
    %c0_27 = arith.constant 0 : index
    %c0_28 = arith.constant 0 : index
    %22 = vector.load %arg1[%c0_24, %c2_25, %c0_26, %c0_27, %c0_28] : memref<1x4x9x9x4xbf16, #tpu.memory_space<vmem>>, vector<1x1x8x8x4xbf16>
    %23 = vector.shape_cast %22 : vector<1x1x8x8x4xbf16> to vector<1x8x8x4xbf16>
    %24 = vector.shape_cast %23 : vector<1x8x8x4xbf16> to vector<64x4xbf16>
    %c3 = arith.constant 3 : index
    %c0_29 = arith.constant 0 : index
    %c0_30 = arith.constant 0 : index
    %25 = vector.load %arg2[%c3, %c0_29, %c0_30] : memref<9x4x128xbf16, #tpu.memory_space<vmem>>, vector<1x4x128xbf16>
    %26 = vector.shape_cast %25 : vector<1x4x128xbf16> to vector<4x128xbf16>
    %cst_31 = arith.constant dense<0.000000e+00> : vector<64x128xf32>
    %27 = tpu.matmul %24, %26, %cst_31 {dimension_numbers = #tpu.dot_dimension_numbers<[1], [0], [0], [1], [0, 0, 1, 1], [], []>} : vector<64x4xbf16>, vector<4x128xbf16>, vector<64x128xf32> -> vector<64x128xf32>
    %28 = arith.addf %21, %27 : vector<64x128xf32>
    %c0_32 = arith.constant 0 : index
    %c3_33 = arith.constant 3 : index
    %c0_34 = arith.constant 0 : index
    %c0_35 = arith.constant 0 : index
    %c0_36 = arith.constant 0 : index
    %29 = vector.load %arg1[%c0_32, %c3_33, %c0_34, %c0_35, %c0_36] : memref<1x4x9x9x4xbf16, #tpu.memory_space<vmem>>, vector<1x1x8x8x4xbf16>
    %30 = vector.shape_cast %29 : vector<1x1x8x8x4xbf16> to vector<1x8x8x4xbf16>
    %31 = vector.shape_cast %30 : vector<1x8x8x4xbf16> to vector<64x4xbf16>
    %c4 = arith.constant 4 : index
    %c0_37 = arith.constant 0 : index
    %c0_38 = arith.constant 0 : index
    %32 = vector.load %arg2[%c4, %c0_37, %c0_38] : memref<9x4x128xbf16, #tpu.memory_space<vmem>>, vector<1x4x128xbf16>
    %33 = vector.shape_cast %32 : vector<1x4x128xbf16> to vector<4x128xbf16>
    %cst_39 = arith.constant dense<0.000000e+00> : vector<64x128xf32>
    %34 = tpu.matmul %31, %33, %cst_39 {dimension_numbers = #tpu.dot_dimension_numbers<[1], [0], [0], [1], [0, 0, 1, 1], [], []>} : vector<64x4xbf16>, vector<4x128xbf16>, vector<64x128xf32> -> vector<64x128xf32>
    %35 = arith.addf %28, %34 : vector<64x128xf32>
    %c0_40 = arith.constant 0 : index
    %c2_41 = arith.constant 2 : index
    %c0_42 = arith.constant 0 : index
    %c1_43 = arith.constant 1 : index
    %c0_44 = arith.constant 0 : index
    %36 = vector.load %arg1[%c0_40, %c2_41, %c0_42, %c1_43, %c0_44] : memref<1x4x9x9x4xbf16, #tpu.memory_space<vmem>>, vector<1x1x8x8x4xbf16>
    %37 = vector.shape_cast %36 : vector<1x1x8x8x4xbf16> to vector<1x8x8x4xbf16>
    %38 = vector.shape_cast %37 : vector<1x8x8x4xbf16> to vector<64x4xbf16>
    %c5 = arith.constant 5 : index
    %c0_45 = arith.constant 0 : index
    %c0_46 = arith.constant 0 : index
    %39 = vector.load %arg2[%c5, %c0_45, %c0_46] : memref<9x4x128xbf16, #tpu.memory_space<vmem>>, vector<1x4x128xbf16>
    %40 = vector.shape_cast %39 : vector<1x4x128xbf16> to vector<4x128xbf16>
    %cst_47 = arith.constant dense<0.000000e+00> : vector<64x128xf32>
    %41 = tpu.matmul %38, %40, %cst_47 {dimension_numbers = #tpu.dot_dimension_numbers<[1], [0], [0], [1], [0, 0, 1, 1], [], []>} : vector<64x4xbf16>, vector<4x128xbf16>, vector<64x128xf32> -> vector<64x128xf32>
    %42 = arith.addf %35, %41 : vector<64x128xf32>
    %c0_48 = arith.constant 0 : index
    %c0_49 = arith.constant 0 : index
    %c1_50 = arith.constant 1 : index
    %c0_51 = arith.constant 0 : index
    %c0_52 = arith.constant 0 : index
    %43 = vector.load %arg1[%c0_48, %c0_49, %c1_50, %c0_51, %c0_52] : memref<1x4x9x9x4xbf16, #tpu.memory_space<vmem>>, vector<1x1x8x8x4xbf16>
    %44 = vector.shape_cast %43 : vector<1x1x8x8x4xbf16> to vector<1x8x8x4xbf16>
    %45 = vector.shape_cast %44 : vector<1x8x8x4xbf16> to vector<64x4xbf16>
    %c6 = arith.constant 6 : index
    %c0_53 = arith.constant 0 : index
    %c0_54 = arith.constant 0 : index
    %46 = vector.load %arg2[%c6, %c0_53, %c0_54] : memref<9x4x128xbf16, #tpu.memory_space<vmem>>, vector<1x4x128xbf16>
    %47 = vector.shape_cast %46 : vector<1x4x128xbf16> to vector<4x128xbf16>
    %cst_55 = arith.constant dense<0.000000e+00> : vector<64x128xf32>
    %48 = tpu.matmul %45, %47, %cst_55 {dimension_numbers = #tpu.dot_dimension_numbers<[1], [0], [0], [1], [0, 0, 1, 1], [], []>} : vector<64x4xbf16>, vector<4x128xbf16>, vector<64x128xf32> -> vector<64x128xf32>
    %49 = arith.addf %42, %48 : vector<64x128xf32>
    %c0_56 = arith.constant 0 : index
    %c1_57 = arith.constant 1 : index
    %c1_58 = arith.constant 1 : index
    %c0_59 = arith.constant 0 : index
    %c0_60 = arith.constant 0 : index
    %50 = vector.load %arg1[%c0_56, %c1_57, %c1_58, %c0_59, %c0_60] : memref<1x4x9x9x4xbf16, #tpu.memory_space<vmem>>, vector<1x1x8x8x4xbf16>
    %51 = vector.shape_cast %50 : vector<1x1x8x8x4xbf16> to vector<1x8x8x4xbf16>
    %52 = vector.shape_cast %51 : vector<1x8x8x4xbf16> to vector<64x4xbf16>
    %c7 = arith.constant 7 : index
    %c0_61 = arith.constant 0 : index
    %c0_62 = arith.constant 0 : index
    %53 = vector.load %arg2[%c7, %c0_61, %c0_62] : memref<9x4x128xbf16, #tpu.memory_space<vmem>>, vector<1x4x128xbf16>
    %54 = vector.shape_cast %53 : vector<1x4x128xbf16> to vector<4x128xbf16>
    %cst_63 = arith.constant dense<0.000000e+00> : vector<64x128xf32>
    %55 = tpu.matmul %52, %54, %cst_63 {dimension_numbers = #tpu.dot_dimension_numbers<[1], [0], [0], [1], [0, 0, 1, 1], [], []>} : vector<64x4xbf16>, vector<4x128xbf16>, vector<64x128xf32> -> vector<64x128xf32>
    %56 = arith.addf %49, %55 : vector<64x128xf32>
    %c0_64 = arith.constant 0 : index
    %c0_65 = arith.constant 0 : index
    %c1_66 = arith.constant 1 : index
    %c1_67 = arith.constant 1 : index
    %c0_68 = arith.constant 0 : index
    %57 = vector.load %arg1[%c0_64, %c0_65, %c1_66, %c1_67, %c0_68] : memref<1x4x9x9x4xbf16, #tpu.memory_space<vmem>>, vector<1x1x8x8x4xbf16>
    %58 = vector.shape_cast %57 : vector<1x1x8x8x4xbf16> to vector<1x8x8x4xbf16>
    %59 = vector.shape_cast %58 : vector<1x8x8x4xbf16> to vector<64x4xbf16>
    %c8 = arith.constant 8 : index
    %c0_69 = arith.constant 0 : index
    %c0_70 = arith.constant 0 : index
    %60 = vector.load %arg2[%c8, %c0_69, %c0_70] : memref<9x4x128xbf16, #tpu.memory_space<vmem>>, vector<1x4x128xbf16>
    %61 = vector.shape_cast %60 : vector<1x4x128xbf16> to vector<4x128xbf16>
    %cst_71 = arith.constant dense<0.000000e+00> : vector<64x128xf32>
    %62 = tpu.matmul %59, %61, %cst_71 {dimension_numbers = #tpu.dot_dimension_numbers<[1], [0], [0], [1], [0, 0, 1, 1], [], []>} : vector<64x4xbf16>, vector<4x128xbf16>, vector<64x128xf32> -> vector<64x128xf32>
    %63 = arith.addf %56, %62 : vector<64x128xf32>
    %c0_72 = arith.constant 0 : index
    %c0_73 = arith.constant 0 : index
    %64 = vector.load %arg3[%c0_72, %c0_73] : memref<1x128xf32, #tpu.memory_space<vmem>>, vector<1x128xf32>
    %65 = vector.broadcast %64 : vector<1x128xf32> to vector<64x128xf32>
    %66 = arith.addf %63, %65 : vector<64x128xf32>
    %67 = vector.shape_cast %66 : vector<64x128xf32> to vector<1x64x128xf32>
    %cst_74 = arith.constant 0.000000e+00 : f32
    %68 = vector.broadcast %cst_74 : f32 to vector<1x64x128xf32>
    %69 = arith.maximumf %67, %68 : vector<1x64x128xf32>
    %70 = arith.truncf %69 : vector<1x64x128xf32> to vector<1x64x128xbf16>
    %c0_75 = arith.constant 0 : index
    %c0_76 = arith.constant 0 : index
    %c0_77 = arith.constant 0 : index
    %71 = vector.load %arg4[%c0_75, %c0_76, %c0_77] : memref<1x64x128xbf16, #tpu.memory_space<vmem>>, vector<1x64x128xbf16>
    tpu.vector_store %arg4[%c0_75, %c0_76, %c0_77], %70 {strides = array<i32>} : memref<1x64x128xbf16, #tpu.memory_space<vmem>>, vector<1x64x128xbf16>,
    return
  }
  func.func @transform_0(%arg0: i32) -> (i32, i32, i32, i32, i32) {
    %c0_i32 = arith.constant 0 : i32
    %c0_i32_0 = arith.constant 0 : i32
    %c0_i32_1 = arith.constant 0 : i32
    %c0_i32_2 = arith.constant 0 : i32
    %c0_i32_3 = arith.constant 0 : i32
    return %arg0, %c0_i32, %c0_i32_0, %c0_i32_1, %c0_i32_2 : i32, i32, i32, i32, i32
  }
  func.func @transform_1(%arg0: i32) -> (i32, i32, i32) {
    %c0_i32 = arith.constant 0 : i32
    %c0_i32_0 = arith.constant 0 : i32
    %c0_i32_1 = arith.constant 0 : i32
    %c0_i32_2 = arith.constant 0 : i32
    return %c0_i32, %c0_i32_0, %c0_i32_1 : i32, i32, i32
  }
  func.func @transform_2(%arg0: i32) -> (i32, i32) {
    %c0_i32 = arith.constant 0 : i32
    %c0_i32_0 = arith.constant 0 : i32
    %c0_i32_1 = arith.constant 0 : i32
    return %c0_i32, %c0_i32_0 : i32, i32
  }
  func.func @transform_3(%arg0: i32) -> (i32, i32, i32) {
    %c0_i32 = arith.constant 0 : i32
    %c0_i32_0 = arith.constant 0 : i32
    %c0_i32_1 = arith.constant 0 : i32
    return %arg0, %c0_i32, %c0_i32_0 : i32, i32, i32
  }
}

module attributes {stable_mosaic.version = 11 : i64} {
  func.func @_conv_bn_kernel(%arg0: i32, %arg1: memref<1x1x8x8x4xbf16, #tpu.memory_space<vmem>>, %arg2: memref<1x4x128xbf16, #tpu.memory_space<vmem>>, %arg3: memref<1x128xf32, #tpu.memory_space<vmem>>, %arg4: memref<1x64x128xf32, #tpu.memory_space<vmem>>) attributes {dimension_semantics = [#tpu.dimension_semantics<parallel>], iteration_bounds = array<i64: 2>, scalar_prefetch = 0 : i64, scratch_operands = 0 : i64, tpu.core_type = #tpu.core_type<tc>, window_params = [{transform_indices = @transform_0, window_bounds = array<i64: 1, 1, 8, 8, 4>}, {pipeline_mode = #tpu.pipeline_mode<synchronous>, transform_indices = @transform_1, window_bounds = array<i64: 1, 4, 128>}, {pipeline_mode = #tpu.pipeline_mode<synchronous>, transform_indices = @transform_2, window_bounds = array<i64: 1, 128>}, {transform_indices = @transform_3, window_bounds = array<i64: 1, 64, 128>}]} {
    %cst = arith.constant 0.000000e+00 : f32
    %0 = vector.broadcast %cst : f32 to vector<64x128xf32>
    %c0 = arith.constant 0 : index
    %c0_0 = arith.constant 0 : index
    %c0_1 = arith.constant 0 : index
    %c0_2 = arith.constant 0 : index
    %c0_3 = arith.constant 0 : index
    %1 = vector.load %arg1[%c0, %c0_0, %c0_1, %c0_2, %c0_3] : memref<1x1x8x8x4xbf16, #tpu.memory_space<vmem>>, vector<1x1x8x8x4xbf16>
    %2 = vector.shape_cast %1 : vector<1x1x8x8x4xbf16> to vector<1x8x8x4xbf16>
    %3 = vector.shape_cast %2 : vector<1x8x8x4xbf16> to vector<64x4xbf16>
    %c0_4 = arith.constant 0 : index
    %c0_5 = arith.constant 0 : index
    %c0_6 = arith.constant 0 : index
    %4 = vector.load %arg2[%c0_4, %c0_5, %c0_6] : memref<1x4x128xbf16, #tpu.memory_space<vmem>>, vector<1x4x128xbf16>
    %5 = vector.shape_cast %4 : vector<1x4x128xbf16> to vector<4x128xbf16>
    %cst_7 = arith.constant dense<0.000000e+00> : vector<64x128xf32>
    %6 = tpu.matmul %3, %5, %cst_7 {dimension_numbers = #tpu.dot_dimension_numbers<[1], [0], [0], [1], [0, 0, 1, 1], [], []>} : vector<64x4xbf16>, vector<4x128xbf16>, vector<64x128xf32> -> vector<64x128xf32>
    %7 = arith.addf %0, %6 : vector<64x128xf32>
    %c0_8 = arith.constant 0 : index
    %c0_9 = arith.constant 0 : index
    %8 = vector.load %arg3[%c0_8, %c0_9] : memref<1x128xf32, #tpu.memory_space<vmem>>, vector<1x128xf32>
    %9 = vector.broadcast %8 : vector<1x128xf32> to vector<64x128xf32>
    %10 = arith.addf %7, %9 : vector<64x128xf32>
    %11 = vector.shape_cast %10 : vector<64x128xf32> to vector<1x64x128xf32>
    %c0_10 = arith.constant 0 : index
    %c0_11 = arith.constant 0 : index
    %c0_12 = arith.constant 0 : index
    %12 = vector.load %arg4[%c0_10, %c0_11, %c0_12] : memref<1x64x128xf32, #tpu.memory_space<vmem>>, vector<1x64x128xf32>
    tpu.vector_store %arg4[%c0_10, %c0_11, %c0_12], %11 {strides = array<i32>} : memref<1x64x128xf32, #tpu.memory_space<vmem>>, vector<1x64x128xf32>,
    return
  }
  func.func @transform_0(%arg0: i32) -> (i32, i32, i32, i32, i32) {
    %c0_i32 = arith.constant 0 : i32
    %c0_i32_0 = arith.constant 0 : i32
    %c0_i32_1 = arith.constant 0 : i32
    %c0_i32_2 = arith.constant 0 : i32
    %c0_i32_3 = arith.constant 0 : i32
    return %arg0, %c0_i32, %c0_i32_0, %c0_i32_1, %c0_i32_2 : i32, i32, i32, i32, i32
  }
  func.func @transform_1(%arg0: i32) -> (i32, i32, i32) {
    %c0_i32 = arith.constant 0 : i32
    %c0_i32_0 = arith.constant 0 : i32
    %c0_i32_1 = arith.constant 0 : i32
    %c0_i32_2 = arith.constant 0 : i32
    return %c0_i32, %c0_i32_0, %c0_i32_1 : i32, i32, i32
  }
  func.func @transform_2(%arg0: i32) -> (i32, i32) {
    %c0_i32 = arith.constant 0 : i32
    %c0_i32_0 = arith.constant 0 : i32
    %c0_i32_1 = arith.constant 0 : i32
    return %c0_i32, %c0_i32_0 : i32, i32
  }
  func.func @transform_3(%arg0: i32) -> (i32, i32, i32) {
    %c0_i32 = arith.constant 0 : i32
    %c0_i32_0 = arith.constant 0 : i32
    %c0_i32_1 = arith.constant 0 : i32
    return %arg0, %c0_i32, %c0_i32_0 : i32, i32, i32
  }
}

module attributes {stable_mosaic.version = 11 : i64} {
  func.func @_conv_bn_kernel(%arg0: i32, %arg1: memref<1x1x10x10x128xbf16, #tpu.memory_space<vmem>>, %arg2: memref<9x128x128xbf16, #tpu.memory_space<vmem>>, %arg3: memref<1x128xf32, #tpu.memory_space<vmem>>, %arg4: memref<1x64x128xf32, #tpu.memory_space<vmem>>, %arg5: memref<1x64x128xf32, #tpu.memory_space<vmem>>) attributes {dimension_semantics = [#tpu.dimension_semantics<parallel>], iteration_bounds = array<i64: 2>, scalar_prefetch = 0 : i64, scratch_operands = 0 : i64, tpu.core_type = #tpu.core_type<tc>, window_params = [{transform_indices = @transform_0, window_bounds = array<i64: 1, 1, 10, 10, 128>}, {pipeline_mode = #tpu.pipeline_mode<synchronous>, transform_indices = @transform_1, window_bounds = array<i64: 9, 128, 128>}, {pipeline_mode = #tpu.pipeline_mode<synchronous>, transform_indices = @transform_2, window_bounds = array<i64: 1, 128>}, {transform_indices = @transform_3, window_bounds = array<i64: 1, 64, 128>}, {transform_indices = @transform_4, window_bounds = array<i64: 1, 64, 128>}]} {
    %cst = arith.constant 0.000000e+00 : f32
    %0 = vector.broadcast %cst : f32 to vector<64x128xf32>
    %c0 = arith.constant 0 : index
    %c0_0 = arith.constant 0 : index
    %c0_1 = arith.constant 0 : index
    %c0_2 = arith.constant 0 : index
    %c0_3 = arith.constant 0 : index
    %1 = vector.load %arg1[%c0, %c0_0, %c0_1, %c0_2, %c0_3] : memref<1x1x10x10x128xbf16, #tpu.memory_space<vmem>>, vector<1x1x8x8x128xbf16>
    %2 = vector.shape_cast %1 : vector<1x1x8x8x128xbf16> to vector<1x8x8x128xbf16>
    %3 = vector.shape_cast %2 : vector<1x8x8x128xbf16> to vector<64x128xbf16>
    %c0_4 = arith.constant 0 : index
    %c0_5 = arith.constant 0 : index
    %c0_6 = arith.constant 0 : index
    %4 = vector.load %arg2[%c0_4, %c0_5, %c0_6] : memref<9x128x128xbf16, #tpu.memory_space<vmem>>, vector<1x128x128xbf16>
    %5 = vector.shape_cast %4 : vector<1x128x128xbf16> to vector<128x128xbf16>
    %cst_7 = arith.constant dense<0.000000e+00> : vector<64x128xf32>
    %6 = tpu.matmul %3, %5, %cst_7 {dimension_numbers = #tpu.dot_dimension_numbers<[1], [0], [0], [1], [0, 0, 1, 1], [], []>} : vector<64x128xbf16>, vector<128x128xbf16>, vector<64x128xf32> -> vector<64x128xf32>
    %7 = arith.addf %0, %6 : vector<64x128xf32>
    %c0_8 = arith.constant 0 : index
    %c0_9 = arith.constant 0 : index
    %c0_10 = arith.constant 0 : index
    %c1 = arith.constant 1 : index
    %c0_11 = arith.constant 0 : index
    %8 = vector.load %arg1[%c0_8, %c0_9, %c0_10, %c1, %c0_11] : memref<1x1x10x10x128xbf16, #tpu.memory_space<vmem>>, vector<1x1x8x8x128xbf16>
    %9 = vector.shape_cast %8 : vector<1x1x8x8x128xbf16> to vector<1x8x8x128xbf16>
    %10 = vector.shape_cast %9 : vector<1x8x8x128xbf16> to vector<64x128xbf16>
    %c1_12 = arith.constant 1 : index
    %c0_13 = arith.constant 0 : index
    %c0_14 = arith.constant 0 : index
    %11 = vector.load %arg2[%c1_12, %c0_13, %c0_14] : memref<9x128x128xbf16, #tpu.memory_space<vmem>>, vector<1x128x128xbf16>
    %12 = vector.shape_cast %11 : vector<1x128x128xbf16> to vector<128x128xbf16>
    %cst_15 = arith.constant dense<0.000000e+00> : vector<64x128xf32>
    %13 = tpu.matmul %10, %12, %cst_15 {dimension_numbers = #tpu.dot_dimension_numbers<[1], [0], [0], [1], [0, 0, 1, 1], [], []>} : vector<64x128xbf16>, vector<128x128xbf16>, vector<64x128xf32> -> vector<64x128xf32>
    %14 = arith.addf %7, %13 : vector<64x128xf32>
    %c0_16 = arith.constant 0 : index
    %c0_17 = arith.constant 0 : index
    %c0_18 = arith.constant 0 : index
    %c2 = arith.constant 2 : index
    %c0_19 = arith.constant 0 : index
    %15 = vector.load %arg1[%c0_16, %c0_17, %c0_18, %c2, %c0_19] : memref<1x1x10x10x128xbf16, #tpu.memory_space<vmem>>, vector<1x1x8x8x128xbf16>
    %16 = vector.shape_cast %15 : vector<1x1x8x8x128xbf16> to vector<1x8x8x128xbf16>
    %17 = vector.shape_cast %16 : vector<1x8x8x128xbf16> to vector<64x128xbf16>
    %c2_20 = arith.constant 2 : index
    %c0_21 = arith.constant 0 : index
    %c0_22 = arith.constant 0 : index
    %18 = vector.load %arg2[%c2_20, %c0_21, %c0_22] : memref<9x128x128xbf16, #tpu.memory_space<vmem>>, vector<1x128x128xbf16>
    %19 = vector.shape_cast %18 : vector<1x128x128xbf16> to vector<128x128xbf16>
    %cst_23 = arith.constant dense<0.000000e+00> : vector<64x128xf32>
    %20 = tpu.matmul %17, %19, %cst_23 {dimension_numbers = #tpu.dot_dimension_numbers<[1], [0], [0], [1], [0, 0, 1, 1], [], []>} : vector<64x128xbf16>, vector<128x128xbf16>, vector<64x128xf32> -> vector<64x128xf32>
    %21 = arith.addf %14, %20 : vector<64x128xf32>
    %c0_24 = arith.constant 0 : index
    %c0_25 = arith.constant 0 : index
    %c1_26 = arith.constant 1 : index
    %c0_27 = arith.constant 0 : index
    %c0_28 = arith.constant 0 : index
    %22 = vector.load %arg1[%c0_24, %c0_25, %c1_26, %c0_27, %c0_28] : memref<1x1x10x10x128xbf16, #tpu.memory_space<vmem>>, vector<1x1x8x8x128xbf16>
    %23 = vector.shape_cast %22 : vector<1x1x8x8x128xbf16> to vector<1x8x8x128xbf16>
    %24 = vector.shape_cast %23 : vector<1x8x8x128xbf16> to vector<64x128xbf16>
    %c3 = arith.constant 3 : index
    %c0_29 = arith.constant 0 : index
    %c0_30 = arith.constant 0 : index
    %25 = vector.load %arg2[%c3, %c0_29, %c0_30] : memref<9x128x128xbf16, #tpu.memory_space<vmem>>, vector<1x128x128xbf16>
    %26 = vector.shape_cast %25 : vector<1x128x128xbf16> to vector<128x128xbf16>
    %cst_31 = arith.constant dense<0.000000e+00> : vector<64x128xf32>
    %27 = tpu.matmul %24, %26, %cst_31 {dimension_numbers = #tpu.dot_dimension_numbers<[1], [0], [0], [1], [0, 0, 1, 1], [], []>} : vector<64x128xbf16>, vector<128x128xbf16>, vector<64x128xf32> -> vector<64x128xf32>
    %28 = arith.addf %21, %27 : vector<64x128xf32>
    %c0_32 = arith.constant 0 : index
    %c0_33 = arith.constant 0 : index
    %c1_34 = arith.constant 1 : index
    %c1_35 = arith.constant 1 : index
    %c0_36 = arith.constant 0 : index
    %29 = vector.load %arg1[%c0_32, %c0_33, %c1_34, %c1_35, %c0_36] : memref<1x1x10x10x128xbf16, #tpu.memory_space<vmem>>, vector<1x1x8x8x128xbf16>
    %30 = vector.shape_cast %29 : vector<1x1x8x8x128xbf16> to vector<1x8x8x128xbf16>
    %31 = vector.shape_cast %30 : vector<1x8x8x128xbf16> to vector<64x128xbf16>
    %c4 = arith.constant 4 : index
    %c0_37 = arith.constant 0 : index
    %c0_38 = arith.constant 0 : index
    %32 = vector.load %arg2[%c4, %c0_37, %c0_38] : memref<9x128x128xbf16, #tpu.memory_space<vmem>>, vector<1x128x128xbf16>
    %33 = vector.shape_cast %32 : vector<1x128x128xbf16> to vector<128x128xbf16>
    %cst_39 = arith.constant dense<0.000000e+00> : vector<64x128xf32>
    %34 = tpu.matmul %31, %33, %cst_39 {dimension_numbers = #tpu.dot_dimension_numbers<[1], [0], [0], [1], [0, 0, 1, 1], [], []>} : vector<64x128xbf16>, vector<128x128xbf16>, vector<64x128xf32> -> vector<64x128xf32>
    %35 = arith.addf %28, %34 : vector<64x128xf32>
    %c0_40 = arith.constant 0 : index
    %c0_41 = arith.constant 0 : index
    %c1_42 = arith.constant 1 : index
    %c2_43 = arith.constant 2 : index
    %c0_44 = arith.constant 0 : index
    %36 = vector.load %arg1[%c0_40, %c0_41, %c1_42, %c2_43, %c0_44] : memref<1x1x10x10x128xbf16, #tpu.memory_space<vmem>>, vector<1x1x8x8x128xbf16>
    %37 = vector.shape_cast %36 : vector<1x1x8x8x128xbf16> to vector<1x8x8x128xbf16>
    %38 = vector.shape_cast %37 : vector<1x8x8x128xbf16> to vector<64x128xbf16>
    %c5 = arith.constant 5 : index
    %c0_45 = arith.constant 0 : index
    %c0_46 = arith.constant 0 : index
    %39 = vector.load %arg2[%c5, %c0_45, %c0_46] : memref<9x128x128xbf16, #tpu.memory_space<vmem>>, vector<1x128x128xbf16>
    %40 = vector.shape_cast %39 : vector<1x128x128xbf16> to vector<128x128xbf16>
    %cst_47 = arith.constant dense<0.000000e+00> : vector<64x128xf32>
    %41 = tpu.matmul %38, %40, %cst_47 {dimension_numbers = #tpu.dot_dimension_numbers<[1], [0], [0], [1], [0, 0, 1, 1], [], []>} : vector<64x128xbf16>, vector<128x128xbf16>, vector<64x128xf32> -> vector<64x128xf32>
    %42 = arith.addf %35, %41 : vector<64x128xf32>
    %c0_48 = arith.constant 0 : index
    %c0_49 = arith.constant 0 : index
    %c2_50 = arith.constant 2 : index
    %c0_51 = arith.constant 0 : index
    %c0_52 = arith.constant 0 : index
    %43 = vector.load %arg1[%c0_48, %c0_49, %c2_50, %c0_51, %c0_52] : memref<1x1x10x10x128xbf16, #tpu.memory_space<vmem>>, vector<1x1x8x8x128xbf16>
    %44 = vector.shape_cast %43 : vector<1x1x8x8x128xbf16> to vector<1x8x8x128xbf16>
    %45 = vector.shape_cast %44 : vector<1x8x8x128xbf16> to vector<64x128xbf16>
    %c6 = arith.constant 6 : index
    %c0_53 = arith.constant 0 : index
    %c0_54 = arith.constant 0 : index
    %46 = vector.load %arg2[%c6, %c0_53, %c0_54] : memref<9x128x128xbf16, #tpu.memory_space<vmem>>, vector<1x128x128xbf16>
    %47 = vector.shape_cast %46 : vector<1x128x128xbf16> to vector<128x128xbf16>
    %cst_55 = arith.constant dense<0.000000e+00> : vector<64x128xf32>
    %48 = tpu.matmul %45, %47, %cst_55 {dimension_numbers = #tpu.dot_dimension_numbers<[1], [0], [0], [1], [0, 0, 1, 1], [], []>} : vector<64x128xbf16>, vector<128x128xbf16>, vector<64x128xf32> -> vector<64x128xf32>
    %49 = arith.addf %42, %48 : vector<64x128xf32>
    %c0_56 = arith.constant 0 : index
    %c0_57 = arith.constant 0 : index
    %c2_58 = arith.constant 2 : index
    %c1_59 = arith.constant 1 : index
    %c0_60 = arith.constant 0 : index
    %50 = vector.load %arg1[%c0_56, %c0_57, %c2_58, %c1_59, %c0_60] : memref<1x1x10x10x128xbf16, #tpu.memory_space<vmem>>, vector<1x1x8x8x128xbf16>
    %51 = vector.shape_cast %50 : vector<1x1x8x8x128xbf16> to vector<1x8x8x128xbf16>
    %52 = vector.shape_cast %51 : vector<1x8x8x128xbf16> to vector<64x128xbf16>
    %c7 = arith.constant 7 : index
    %c0_61 = arith.constant 0 : index
    %c0_62 = arith.constant 0 : index
    %53 = vector.load %arg2[%c7, %c0_61, %c0_62] : memref<9x128x128xbf16, #tpu.memory_space<vmem>>, vector<1x128x128xbf16>
    %54 = vector.shape_cast %53 : vector<1x128x128xbf16> to vector<128x128xbf16>
    %cst_63 = arith.constant dense<0.000000e+00> : vector<64x128xf32>
    %55 = tpu.matmul %52, %54, %cst_63 {dimension_numbers = #tpu.dot_dimension_numbers<[1], [0], [0], [1], [0, 0, 1, 1], [], []>} : vector<64x128xbf16>, vector<128x128xbf16>, vector<64x128xf32> -> vector<64x128xf32>
    %56 = arith.addf %49, %55 : vector<64x128xf32>
    %c0_64 = arith.constant 0 : index
    %c0_65 = arith.constant 0 : index
    %c2_66 = arith.constant 2 : index
    %c2_67 = arith.constant 2 : index
    %c0_68 = arith.constant 0 : index
    %57 = vector.load %arg1[%c0_64, %c0_65, %c2_66, %c2_67, %c0_68] : memref<1x1x10x10x128xbf16, #tpu.memory_space<vmem>>, vector<1x1x8x8x128xbf16>
    %58 = vector.shape_cast %57 : vector<1x1x8x8x128xbf16> to vector<1x8x8x128xbf16>
    %59 = vector.shape_cast %58 : vector<1x8x8x128xbf16> to vector<64x128xbf16>
    %c8 = arith.constant 8 : index
    %c0_69 = arith.constant 0 : index
    %c0_70 = arith.constant 0 : index
    %60 = vector.load %arg2[%c8, %c0_69, %c0_70] : memref<9x128x128xbf16, #tpu.memory_space<vmem>>, vector<1x128x128xbf16>
    %61 = vector.shape_cast %60 : vector<1x128x128xbf16> to vector<128x128xbf16>
    %cst_71 = arith.constant dense<0.000000e+00> : vector<64x128xf32>
    %62 = tpu.matmul %59, %61, %cst_71 {dimension_numbers = #tpu.dot_dimension_numbers<[1], [0], [0], [1], [0, 0, 1, 1], [], []>} : vector<64x128xbf16>, vector<128x128xbf16>, vector<64x128xf32> -> vector<64x128xf32>
    %63 = arith.addf %56, %62 : vector<64x128xf32>
    %c0_72 = arith.constant 0 : index
    %c0_73 = arith.constant 0 : index
    %64 = vector.load %arg3[%c0_72, %c0_73] : memref<1x128xf32, #tpu.memory_space<vmem>>, vector<1x128xf32>
    %65 = vector.broadcast %64 : vector<1x128xf32> to vector<64x128xf32>
    %66 = arith.addf %63, %65 : vector<64x128xf32>
    %67 = vector.shape_cast %66 : vector<64x128xf32> to vector<1x64x128xf32>
    %c0_74 = arith.constant 0 : index
    %c0_75 = arith.constant 0 : index
    %c0_76 = arith.constant 0 : index
    %68 = vector.load %arg4[%c0_74, %c0_75, %c0_76] : memref<1x64x128xf32, #tpu.memory_space<vmem>>, vector<1x64x128xf32>
    %69 = arith.addf %67, %68 : vector<1x64x128xf32>
    %cst_77 = arith.constant 0.000000e+00 : f32
    %70 = vector.broadcast %cst_77 : f32 to vector<1x64x128xf32>
    %71 = arith.maximumf %69, %70 : vector<1x64x128xf32>
    %c0_78 = arith.constant 0 : index
    %c0_79 = arith.constant 0 : index
    %c0_80 = arith.constant 0 : index
    %72 = vector.load %arg5[%c0_78, %c0_79, %c0_80] : memref<1x64x128xf32, #tpu.memory_space<vmem>>, vector<1x64x128xf32>
    tpu.vector_store %arg5[%c0_78, %c0_79, %c0_80], %71 {strides = array<i32>} : memref<1x64x128xf32, #tpu.memory_space<vmem>>, vector<1x64x128xf32>,
    return
  }
  func.func @transform_0(%arg0: i32) -> (i32, i32, i32, i32, i32) {
    %c0_i32 = arith.constant 0 : i32
    %c0_i32_0 = arith.constant 0 : i32
    %c0_i32_1 = arith.constant 0 : i32
    %c0_i32_2 = arith.constant 0 : i32
    %c0_i32_3 = arith.constant 0 : i32
    return %arg0, %c0_i32, %c0_i32_0, %c0_i32_1, %c0_i32_2 : i32, i32, i32, i32, i32
  }
  func.func @transform_1(%arg0: i32) -> (i32, i32, i32) {
    %c0_i32 = arith.constant 0 : i32
    %c0_i32_0 = arith.constant 0 : i32
    %c0_i32_1 = arith.constant 0 : i32
    %c0_i32_2 = arith.constant 0 : i32
    return %c0_i32, %c0_i32_0, %c0_i32_1 : i32, i32, i32
  }
  func.func @transform_2(%arg0: i32) -> (i32, i32) {
    %c0_i32 = arith.constant 0 : i32
    %c0_i32_0 = arith.constant 0 : i32
    %c0_i32_1 = arith.constant 0 : i32
    return %c0_i32, %c0_i32_0 : i32, i32
  }
  func.func @transform_3(%arg0: i32) -> (i32, i32, i32) {
    %c0_i32 = arith.constant 0 : i32
    %c0_i32_0 = arith.constant 0 : i32
    %c0_i32_1 = arith.constant 0 : i32
    return %arg0, %c0_i32, %c0_i32_0 : i32, i32, i32
  }
  func.func @transform_4(%arg0: i32) -> (i32, i32, i32) {
    %c0_i32 = arith.constant 0 : i32
    %c0_i32_0 = arith.constant 0 : i32
    %c0_i32_1 = arith.constant 0 : i32
    return %arg0, %c0_i32, %c0_i32_0 : i32, i32, i32
  }
}

</mosaic_0001>

<bundles_post_ra>
// kernel: basic_block_forward.3
= control target key start
LH: loop header
LB: loop body
LE: loop exit
PB: predicated region body
PF: predicated region fallthrough
CT: control target
= control target key end

     0   :  { %s2156_s12 = smov 0   ;;  %s2417_s0 = inlined_call_operand.vmem [shape: bf16[2,4,9,9,4], index: 0, kind: input, shape index: {}]   ;;  %s2418_s1 = inlined_call_operand.vmem [shape: bf16[9,4,128], index: 1, kind: input, shape index: {}]   ;;  %s2419_s2 = inlined_call_operand.vmem [shape: f32[1,128], index: 2, kind: input, shape index: {}]   ;;  %s2420_s3 = inlined_call_operand.vmem [shape: bf16[2,64,128], index: 3, kind: output, shape index: {}]  }
   0x1 LB: > { %s1681_s13 = sadd.s32 4294967295, %s2134_s12   ;;  %p1685_p0 = scmp.ge.s32.totalorder %s2134_s12, 1  ;;  %s2134_s12 = sphi %s2156_s12, %s13_s12  }
   0x2   : > { %p137_p1 = scmp.lt.s32.totalorder %s2134_s12, 3 }
   0x4   : > { %p138_p2 = pnand %p1685_p0, %p137_p1 }
   0x5   : > { %v1697_v0 = vld [vmem:[%s2418_s1 + $0x2] sm:$0x3] (!%p138_p2)  ;;  %vm225_vm0 = vcmask (!%p138_p2), 1041408   ;;  %v2170_v1 = vld [vmem:[%s2418_s1 + $0x8] sm:$0x3] (!%p138_p2)  ;;  %p161_p3 = scmp.lt.s32.totalorder (!%p138_p2), %s1681_s13, 1 }
   0x6   : > { %141 = sbr.rel (%p138_p2) target bundleno = 318 (0x13e), region = 32  ;;  %2085 = vmatprep.subr.msk.bf16.mxu1 (!%p138_p2), %vm225_vm0, %v1697_v0  ;;  %2089 = vmatprep.subr.msk.bf16.mxu0 (!%p138_p2), %vm225_vm0, %v2170_v1  ;;  %v227_v2 = vsel (!%p138_p2), %vm225_vm0, %v1697_v0, 0  ;;  %v2178_v3 = vsel (!%p138_p2), %vm225_vm0, %v2170_v1, 0  ;;  %v180_v4 = vld [vmem:[%s2418_s1] sm:$0x3] (!%p138_p2)  ;;  %vm212_vm1 = vcmask (!%p138_p2), 31744  }
   0x7   : > { %1930 = vmatpush3.bf16.msra.mxu1 (!%p138_p2), %v227_v2  ;;  %1970 = vmatpush3.bf16.msra.mxu0 (!%p138_p2), %v2178_v3  ;;  %v1773_v5 = vld [vmem:[%s2418_s1 + $0xa] sm:$0x3] (!%p138_p2)  ;;  %v327_v6 = vsel (!%p138_p2), %vm225_vm0, %v180_v4, 0  ;;  %v1790_v9 = vld [vmem:[%s2418_s1 + $0xc] sm:$0x3] (!%p138_p2) }
   0x8   : > { %2086 = vmatprep.subr.msk.bf16.mxu1 (!%p138_p2), %vm225_vm0, %v180_v4  ;;  %2091 = vmatprep.subr.msk.bf16.mxu0 (!%p138_p2), %vm225_vm0, %v1773_v5  ;;  %v1020_v7 = vsel (!%p138_p2), %vm225_vm0, %v1773_v5, 0  ;;  %v1714_v10 = vld [vmem:[%s2418_s1 + $0x4] sm:$0x3] (!%p138_p2)  ;;  %vm410_vm2 = vsmask.f32 (!%p138_p2), 3328  ;;  %v2215_v15 = vsel (!%p138_p2), %vm225_vm0, %v1790_v9, 0 }
   0x9   : > { %vm411_vm3 = vsmask.f32 (!%p138_p2), 7440  ;;  %v2218_v16 = vsel (!%p138_p2), %vm225_vm0, %v1714_v10, 0 }
   0xa   : > { %vm2235_vm4 = vmor (!%p138_p2), %vm410_vm2, %vm411_vm3 }
   0xd   : > { %s2424_s13 = smov (!%p161_p3, %s1681_s13), 1 }
   0xe   : > { %s2095_s22 = smul.u32 288, %s2424_s13  ;;  %s1852_s11 = sshll.u32 %s2424_s13, 5 }
   0xf   : > { %s170_s16 = scalar_lea.vmem %s2420_s3, %s1852_s11 }
  0x10   : > { %s2195_s25 = scalar_lea.vmem %s2417_s0, %s2095_s22 }
  0x11   : > { %v2104_v8 = vld [vmem:[%s2195_s25 + $0x48] ss:$8 sps:$4 sm:$0xff]   ;;  %v2105_v11 = vld [vmem:[%s2195_s25 + $0xd8] ss:$8 sps:$4 sm:$0xff]   ;;  %v1758_v19 = vld [vmem:[%s2195_s25 + $0x94] sm:$0x1] }
  0x12   : > { %1931 = vmatprep.mubr.msk.bf16.mxu1 %vm212_vm1, %v2104_v8  ;;  %v2106_v12 = vld [vmem:[%s2195_s25 + $0x58] ss:$8 sps:$4 sm:$0xff]   ;;  %1971 = vmatprep.mubr.msk.bf16.mxu0 %vm212_vm1, %v2105_v11  ;;  %v2107_v13 = vld [vmem:[%s2195_s25 + $0xe8] ss:$8 sps:$4 sm:$0xff]   ;;  %v1760_v21 = vld [vmem:[%s2195_s25 + $0x9c] sm:$0x1] }
  0x13   : > { %1932 = vmatmul.mubr.msk.bf16.vlgmr.msra.gmra.mrb[0].mxu1 %vm212_vm1, %v2106_v12  ;;  %v2108_v14 = vld [vmem:[%s2195_s25 + $0x68] ss:$8 sps:$4 sm:$0xff]   ;;  %1972 = vmatmul.mubr.msk.bf16.vlgmr.msra.gmra.mrb[0].mxu0 %vm212_vm1, %v2107_v13  ;;  %v2109_v17 = vld [vmem:[%s2195_s25 + $0x78] ss:$8 sps:$4 sm:$0xff]   ;;  %v891_v24 = vshll.u32 %v1758_v19, 16  ;;  %v905_v27 = vshll.u32 %v1760_v21, 16 }
  0x14   : > { %1940 = vmatpush3.bf16.msra.mxu1 %v327_v6  ;;  %1980 = vmatpush3.bf16.msra.mxu0 %v1020_v7  ;;  %v1757_v18 = vld [vmem:[%s2195_s25 + $0x90] sm:$0xf]  ;;  %v1759_v20 = vld [vmem:[%s2195_s25 + $0x98] sm:$0xf]  ;;  %v1761_v28 = vld [vmem:[%s2195_s25 + $0xa0] sm:$0xf] }
  0x15   : > { %1935 = vmatprep.mubr.msk.bf16.mxu1 %vm212_vm1, %v2108_v14  ;;  %v882_v22 = vshrl.u32 %v1757_v18, 16  ;;  %v885_v23 = vshll.u32 %v1757_v18, 16  ;;  %v896_v25 = vshrl.u32 %v1759_v20, 16  ;;  %2092 = vmatprep.subr.msk.bf16.mxu0 %vm225_vm0, %v1790_v9  ;;  %v899_v26 = vshll.u32 %v1759_v20, 16  ;;  %v1762_v29 = vld [vmem:[%s2195_s25 + $0xa4] sm:$0x1] }
  0x16   : > { %2087 = vmatprep.subr.msk.bf16.mxu1 %vm225_vm0, %v1714_v10  ;;  %v893_v32 = vrot.slane %v891_v24, 5  ;;  %v1763_v34 = vld [vmem:[%s2195_s25 + $0xa8] sm:$0xf]  ;;  %v907_v36 = vrot.slane %v905_v27, 5  ;;  %v1764_v37 = vld [vmem:[%s2195_s25 + $0xac] sm:$0x1] }
  0x17   : > { %v884_v30 = vrot.slane %v882_v22, 4  ;;  %v887_v31 = vrot.slane %v885_v23, 5  ;;  %v898_v33 = vrot.slane %v896_v25, 4  ;;  %v901_v35 = vrot.slane %v899_v26, 5  ;;  %v2110_v53 = vld [vmem:[%s2195_s25] ss:$8 sps:$4 sm:$0xff]  }
  0x18   : > { %v910_v38 = vshrl.u32 %v1761_v28, 16  ;;  %v913_v39 = vshll.u32 %v1761_v28, 16  ;;  %v919_v41 = vshll.u32 %v1762_v29, 16  ;;  %v924_v42 = vshrl.u32 %v1763_v34, 16  ;;  %v2111_v59 = vld [vmem:[%s2195_s25 + $0x10] ss:$8 sps:$4 sm:$0xff]  }
  0x19   : > { %v888_v40 = vor.u32 %v887_v31, %v884_v30  ;;  %v927_v43 = vshll.u32 %v1763_v34, 16  ;;  %v902_v45 = vor.u32 %v901_v35, %v898_v33  ;;  %v933_v48 = vshll.u32 %v1764_v37, 16  ;;  %v1765_v60 = vld [vmem:[%s2195_s25 + $0xb0] sm:$0xf]  ;;  %v1766_v61 = vld [vmem:[%s2195_s25 + $0xb4] sm:$0x1] }
  0x1a   : > { %v912_v46 = vrot.slane %v910_v38, 4  ;;  %v915_v47 = vrot.slane %v913_v39, 5  ;;  %v921_v50 = vrot.slane %v919_v41, 5  ;;  %v926_v51 = vrot.slane %v924_v42, 4  ;;  %v1767_v0 = vld [vmem:[%s2195_s25 + $0xb8] sm:$0xf] }
  0x1b   : > { %1936 = vmatmul.mubr.msk.bf16.gmra.mrb[4].mxu1 %vm212_vm1, %v2109_v17  ;;  %v889_v49 = vrot.slane %v888_v40, 4  ;;  %v929_v52 = vrot.slane %v927_v43, 5  ;;  %v903_v54 = vrot.slane %v902_v45, 4  ;;  %v935_v56 = vrot.slane %v933_v48, 5  ;;  %v1768_v2 = vld [vmem:[%s2195_s25 + $0xbc] sm:$0x1] }
  0x1c   : > { %v916_v55 = vor.u32 %v915_v47, %v912_v46  ;;  %1941 = vmatprep.mubr.msk.bf16.mxu1 %vm212_vm1, %v2110_v53  ;;  %v938_v4 = vshrl.u32 %v1765_v60, 16  ;;  %v941_v7 = vshll.u32 %v1765_v60, 16  ;;  %v947_v8 = vshll.u32 %v1766_v61, 16  ;;  %v1769_v9 = vld [vmem:[%s2195_s25 + $0xc0] sm:$0xf] }
  0x1d   : > { %v894_v57 = vsel %vm2235_vm4, %v889_v49, %v893_v32  ;;  %v930_v58 = vor.u32 %v929_v52, %v926_v51  ;;  %v908_v62 = vsel %vm2235_vm4, %v903_v54, %v907_v36  ;;  %v2254_v10 = vld [vmem:[%s2418_s1 + $0x6] sm:$0x3]  ;;  %v952_v13 = vshrl.u32 %v1767_v0, 16  ;;  %v1770_v17 = vld [vmem:[%s2195_s25 + $0xc4] sm:$0x1] }
  0x1e   : > { %v917_v63 = vrot.slane %v916_v55, 4  ;;  %v1774_v5 = vcombine.low %v894_v57, %v908_v62  ;;  %v940_v12 = vrot.slane %v938_v4, 4  ;;  %v955_v14 = vshll.u32 %v1767_v0, 16  ;;  %v1771_v22 = vld [vmem:[%s2195_s25 + $0xc8] sm:$0xf] }
  0x1f   : > { %v931_v6 = vrot.slane %v930_v58, 4  ;;  %v943_v19 = vrot.slane %v941_v7, 5  ;;  %v949_v20 = vrot.slane %v947_v8, 5  ;;  %v961_v21 = vshll.u32 %v1768_v2, 16  ;;  %v2266_v23 = vld [vmem:[%s2418_s1 + $0xe] sm:$0x3] }
  0x20   : > { %v922_v11 = vsel %vm2235_vm4, %v917_v63, %v921_v50  ;;  %1981 = vmatprep.mubr.msk.bf16.mxu0 %vm212_vm1, %v1774_v5  ;;  %v954_v25 = vrot.slane %v952_v13, 4  ;;  %v957_v26 = vrot.slane %v955_v14, 5  ;;  %v1772_v27 = vld [vmem:[%s2195_s25 + $0xcc] sm:$0x1]  ;;  %v966_v28 = vshrl.u32 %v1769_v9, 16 }
  0x21   : > { %v936_v18 = vsel %vm2235_vm4, %v931_v6, %v935_v56  ;;  %v944_v29 = vor.u32 %v943_v19, %v940_v12  ;;  %v963_v30 = vrot.slane %v961_v21, 5  ;;  %v969_v31 = vshll.u32 %v1769_v9, 16  ;;  %v2114_v53 = vld [vmem:[%s2195_s25 + $0x8] ss:$8 sps:$4 sm:$0xff]   ;;  %v394_v54 = vld [vmem:[%s2195_s25] sm:$0xf] }
  0x22   : > { %v1775_v24 = vcombine.low %v922_v11, %v936_v18  ;;  %v975_v32 = vshll.u32 %v1770_v17, 16  ;;  %v958_v33 = vor.u32 %v957_v26, %v954_v25  ;;  %v968_v34 = vrot.slane %v966_v28, 4  ;;  %v395_v56 = vld [vmem:[%s2195_s25 + $0x4] sm:$0x1]  ;;  %v396_v57 = vld [vmem:[%s2195_s25 + $0x8] sm:$0xf] }
  0x23   : > { %1942 = vmatmul.mubr.msk.bf16.vlgmr.msra.gmra.mrb[0].mxu1 %vm212_vm1, %v2111_v59  ;;  %v980_v35 = vshrl.u32 %v1771_v22, 16  ;;  %v983_v36 = vshll.u32 %v1771_v22, 16  ;;  %v945_v37 = vrot.slane %v944_v29, 4  ;;  %v971_v38 = vrot.slane %v969_v31, 5  ;;  %v397_v58 = vld [vmem:[%s2195_s25 + $0xc] sm:$0x1] }
  0x24   : > { %1950 = vmatpush3.bf16.msra.mxu1 %v2218_v16  ;;  %1982 = vmatmul.mubr.msk.bf16.vlgmr.msra.gmra.mrb[0].mxu0 %vm212_vm1, %v1775_v24  ;;  %v989_v39 = vshll.u32 %v1772_v27, 16  ;;  %v2112_v16 = vld [vmem:[%s2195_s25 + $0x20] ss:$8 sps:$4 sm:$0xff]   ;;  %v959_v40 = vrot.slane %v958_v33, 4  ;;  %v977_v46 = vrot.slane %v975_v32, 5  ;;  %v414_v60 = vshrl.u32 %v394_v54, 16 }
  0x25   : > { %2088 = vmatprep.subr.msk.bf16.mxu1 %vm225_vm0, %v2254_v10  ;;  %1990 = vmatpush3.bf16.msra.mxu0 %v2215_v15  ;;  %v982_v41 = vrot.slane %v980_v35, 4  ;;  %v985_v42 = vrot.slane %v983_v36, 5  ;;  %v950_v43 = vsel %vm2235_vm4, %v945_v37, %v949_v20  ;;  %v972_v45 = vor.u32 %v971_v38, %v968_v34  ;;  %v2113_v15 = vld [vmem:[%s2195_s25 + $0x30] ss:$8 sps:$4 sm:$0xff]   ;;  %v399_v6 = vld [vmem:[%s2195_s25 + $0x14] sm:$0x1] }
  0x26   : > { %2093 = vmatprep.subr.msk.bf16.mxu0 %vm225_vm0, %v2266_v23  ;;  %1945 = vmatprep.mubr.msk.bf16.mxu1 %vm212_vm1, %v2112_v16  ;;  %v964_v47 = vsel %vm2235_vm4, %v959_v40, %v963_v30  ;;  %v991_v49 = vrot.slane %v989_v39, 5  ;;  %v417_v61 = vshll.u32 %v394_v54, 16  ;;  %v423_v62 = vshll.u32 %v395_v56, 16  ;;  %v398_v63 = vld [vmem:[%s2195_s25 + $0x10] sm:$0xf] }
  0x27   : > { %v986_v48 = vor.u32 %v985_v42, %v982_v41  ;;  %v1776_v50 = vcombine.low %v950_v43, %v964_v47  ;;  %v973_v51 = vrot.slane %v972_v45, 4  ;;  %v428_v2 = vshrl.u32 %v396_v57, 16  ;;  %v400_v11 = vld [vmem:[%s2195_s25 + $0x18] sm:$0xf]  ;;  %v401_v18 = vld [vmem:[%s2195_s25 + $0x1c] sm:$0x1] }
  0x28   : > { %v431_v4 = vshll.u32 %v396_v57, 16  ;;  %v437_v5 = vshll.u32 %v397_v58, 16  ;;  %v416_v7 = vrot.slane %v414_v60, 4  ;;  %v419_v8 = vrot.slane %v417_v61, 5  ;;  %v2115_v29 = vld [vmem:[%s2195_s25 + $0x18] ss:$8 sps:$4 sm:$0xff]  }
  0x29   : > { %v987_v52 = vrot.slane %v986_v48, 4  ;;  %1985 = vmatprep.mubr.msk.bf16.mxu0 %vm212_vm1, %v1776_v50  ;;  %v978_v55 = vsel %vm2235_vm4, %v973_v51, %v977_v46  ;;  %v425_v9 = vrot.slane %v423_v62, 5  ;;  %v442_v12 = vshrl.u32 %v398_v63, 16  ;;  %v2116_v37 = vld [vmem:[%s2195_s25 + $0x28] ss:$8 sps:$4 sm:$0xff]  }
  0x2a   : > { %v430_v13 = vrot.slane %v428_v2, 4  ;;  %v433_v14 = vrot.slane %v431_v4, 5  ;;  %v439_v17 = vrot.slane %v437_v5, 5  ;;  %v445_v19 = vshll.u32 %v398_v63, 16  ;;  %v402_v40 = vld [vmem:[%s2195_s25 + $0x20] sm:$0xf] }
  0x2b   : > { %1946 = vmatmul.mubr.msk.bf16.gmra.mrb[4].mxu1 %vm212_vm1, %v2113_v15  ;;  %v992_v59 = vsel %vm2235_vm4, %v987_v52, %v991_v49  ;;  %v420_v20 = vor.u32 %v419_v8, %v416_v7  ;;  %v444_v21 = vrot.slane %v442_v12, 4  ;;  %v451_v22 = vshll.u32 %v399_v6, 16  ;;  %v403_v45 = vld [vmem:[%s2195_s25 + $0x24] sm:$0x1]  ;;  %v404_v46 = vld [vmem:[%s2195_s25 + $0x28] sm:$0xf] }
  0x2c   : > { %v1777_v0 = vcombine.low %v978_v55, %v992_v59  ;;  %v456_v24 = vshrl.u32 %v400_v11, 16  ;;  %v434_v25 = vor.u32 %v433_v14, %v430_v13  ;;  %v447_v26 = vrot.slane %v445_v19, 5  ;;  %v405_v48 = vld [vmem:[%s2195_s25 + $0x2c] sm:$0x1]  ;;  %v406_v55 = vld [vmem:[%s2195_s25 + $0x30] sm:$0xf] }
  0x2d   : > { %v459_v27 = vshll.u32 %v400_v11, 16  ;;  %v465_v28 = vshll.u32 %v401_v18, 16  ;;  %v1258_v30 = vsel %vm225_vm0, %v2266_v23, 0  ;;  %v421_v31 = vrot.slane %v420_v20, 4  ;;  %v2313_v23 = vld [vmem:[%s2418_s1 + $0x10] sm:$0x3] }
  0x2e   : > { %1986 = vmatmul.mubr.msk.bf16.gmra.mrb[4].mxu0 %vm212_vm1, %v1777_v0  ;;  %v453_v32 = vrot.slane %v451_v22, 5  ;;  %v458_v33 = vrot.slane %v456_v24, 4  ;;  %v435_v34 = vrot.slane %v434_v25, 4  ;;  %v448_v35 = vor.u32 %v447_v26, %v444_v21  ;;  %v407_v60 = vld [vmem:[%s2195_s25 + $0x34] sm:$0x1] }
  0x2f   : > { %1991 = vmatprep.mubr.msk.bf16.mxu0 %vm212_vm1, %v2114_v53  ;;  %v461_v36 = vrot.slane %v459_v27, 5  ;;  %v426_v38 = vsel %vm2235_vm4, %v421_v31, %v425_v9  ;;  %v467_v39 = vrot.slane %v465_v28, 5  ;;  %v671_v16 = vsel %vm225_vm0, %v2254_v10, 0  ;;  %v2117_v62 = vld [vmem:[%s2195_s25 + $0x38] ss:$8 sps:$4 sm:$0xff]  }
  0x30   : > { %v440_v41 = vsel %vm2235_vm4, %v435_v34, %v439_v17  ;;  %v449_v42 = vrot.slane %v448_v35, 4  ;;  %v470_v15 = vshrl.u32 %v402_v40, 16  ;;  %v473_v49 = vshll.u32 %v402_v40, 16  ;;  %v408_v0 = vld [vmem:[%s2195_s25 + $0x38] sm:$0xf] }
  0x31   : > { %v462_v43 = vor.u32 %v461_v36, %v458_v33  ;;  %v1715_v47 = vcombine.low %v426_v38, %v440_v41  ;;  %v479_v10 = vshll.u32 %v403_v45, 16  ;;  %v484_v50 = vshrl.u32 %v404_v46, 16  ;;  %v409_v2 = vld [vmem:[%s2195_s25 + $0x3c] sm:$0x1]  ;;  %v2118_v14 = vld [vmem:[%s2195_s25 + $0x50] ss:$8 sps:$4 sm:$0xff]  }
  0x32   : > { %v454_v51 = vsel %vm2235_vm4, %v449_v42, %v453_v32  ;;  %v472_v53 = vrot.slane %v470_v15, 4  ;;  %v487_v54 = vshll.u32 %v404_v46, 16  ;;  %v475_v56 = vrot.slane %v473_v49, 5  ;;  %v2119_v35 = vld [vmem:[%s2195_s25 + $0x60] ss:$8 sps:$4 sm:$0xff]  }
  0x33   : > { %v463_v52 = vrot.slane %v462_v43, 4  ;;  %1951 = vmatprep.mubr.msk.bf16.mxu1 %vm212_vm1, %v1715_v47  ;;  %v481_v57 = vrot.slane %v479_v10, 5  ;;  %v486_v58 = vrot.slane %v484_v50, 4  ;;  %v493_v59 = vshll.u32 %v405_v48, 16  ;;  %v1817_v40 = vld [vmem:[%s2195_s25 + $0xc] sm:$0x1] }
  0x34   : > { %v489_v63 = vrot.slane %v487_v54, 5  ;;  %v498_v4 = vshrl.u32 %v406_v55, 16  ;;  %v476_v6 = vor.u32 %v475_v56, %v472_v53  ;;  %v501_v8 = vshll.u32 %v406_v55, 16  ;;  %v1818_v41 = vld [vmem:[%s2195_s25 + $0x10] sm:$0xf] }
  0x35   : > { %v468_v61 = vsel %vm2235_vm4, %v463_v52, %v467_v39  ;;  %v495_v7 = vrot.slane %v493_v59, 5  ;;  %v507_v12 = vshll.u32 %v407_v60, 16  ;;  %v512_v13 = vshrl.u32 %v408_v0, 16  ;;  %v2122_v39 = vld [vmem:[%s2195_s25 + $0x70] ss:$8 sps:$4 sm:$0xff]  }
  0x36   : > { %1992 = vmatmul.mubr.msk.bf16.vlgmr.msra.gmra.mrb[0].mxu0 %vm212_vm1, %v2115_v29  ;;  %v1716_v5 = vcombine.low %v454_v51, %v468_v61  ;;  %v490_v9 = vor.u32 %v489_v63, %v486_v58  ;;  %v500_v11 = vrot.slane %v498_v4, 4  ;;  %v477_v17 = vrot.slane %v476_v6, 4  ;;  %v1819_v42 = vld [vmem:[%s2195_s25 + $0x14] sm:$0x1]  ;;  %v1820_v48 = vld [vmem:[%s2195_s25 + $0x18] sm:$0xf] }
  0x37   : > { %2000 = vmatpush3.bf16.msra.mxu0 %v1258_v30  ;;  %1995 = vmatprep.mubr.msk.bf16.mxu0 %vm212_vm1, %v2116_v37  ;;  %v503_v18 = vrot.slane %v501_v8, 5  ;;  %v515_v19 = vshll.u32 %v408_v0, 16  ;;  %v521_v20 = vshll.u32 %v409_v2, 16  ;;  %v514_v22 = vrot.slane %v512_v13, 4  ;;  %v2120_v37 = vld [vmem:[%s2195_s25 + $0x90] ss:$8 sps:$4 sm:$0xff]  }
  0x38   : > { %2094 = vmatprep.subr.msk.bf16.mxu0 %vm225_vm0, %v2313_v23  ;;  %1952 = vmatmul.mubr.msk.bf16.vlgmr.msra.gmra.mrb[0].mxu1 %vm212_vm1, %v1716_v5  ;;  %v491_v21 = vrot.slane %v490_v9, 4  ;;  %v482_v24 = vsel %vm2235_vm4, %v477_v17, %v481_v57  ;;  %v509_v26 = vrot.slane %v507_v12, 5  ;;  %v1488_v34 = vsel %vm225_vm0, %v2313_v23, 0  ;;  %v1821_v50 = vld [vmem:[%s2195_s25 + $0x1c] sm:$0x1] }
  0x39   : > { %1960 = vmatpush3.bf16.msra.mxu1 %v671_v16  ;;  %v504_v25 = vor.u32 %v503_v18, %v500_v11  ;;  %v517_v27 = vrot.slane %v515_v19, 5  ;;  %v523_v32 = vrot.slane %v521_v20, 5  ;;  %v1816_v16 = vld [vmem:[%s2195_s25 + $0x8] sm:$0xf]  ;;  %v1359_v23 = vshll.u32 %v1817_v40, 16 }
  0x3a   : > { %2090 = vmatprep.subr.msk.bf16.mxu1 %vm225_vm0, %v2170_v1  ;;  %v496_v28 = vsel %vm2235_vm4, %v491_v21, %v495_v7  ;;  %v1350_v43 = vshrl.u32 %v1816_v16, 16  ;;  %v1353_v45 = vshll.u32 %v1816_v16, 16  ;;  %v1364_v46 = vshrl.u32 %v1818_v41, 16  ;;  %v1822_v51 = vld [vmem:[%s2195_s25 + $0x20] sm:$0xf] }
  0x3b   : > { %v1717_v29 = vcombine.low %v482_v24, %v496_v28  ;;  %v505_v30 = vrot.slane %v504_v25, 4  ;;  %v518_v31 = vor.u32 %v517_v27, %v514_v22  ;;  %v1367_v15 = vshll.u32 %v1818_v41, 16  ;;  %v2121_v52 = vld [vmem:[%s2195_s25 + $0xa0] ss:$8 sps:$4 sm:$0xff]   ;;  %v1823_v58 = vld [vmem:[%s2195_s25 + $0x24] sm:$0x1] }
  0x3c   : > { %v1373_v47 = vshll.u32 %v1819_v42, 16  ;;  %v1352_v49 = vrot.slane %v1350_v43, 4  ;;  %v1355_v10 = vrot.slane %v1353_v45, 5  ;;  %v2123_v53 = vld [vmem:[%s2195_s25 + $0x80] ss:$8 sps:$4 sm:$0xff]   ;;  %v1361_v54 = vrot.slane %v1359_v23, 5 }
  0x3d   : > { %1955 = vmatprep.mubr.msk.bf16.mxu1 %vm212_vm1, %v1717_v29  ;;  %v510_v1 = vsel %vm2235_vm4, %v505_v30, %v509_v26  ;;  %v519_v33 = vrot.slane %v518_v31, 4  ;;  %v1366_v55 = vrot.slane %v1364_v46, 4  ;;  %v1369_v56 = vrot.slane %v1367_v15, 5  ;;  %v2124_v5 = vld [vmem:[%s2195_s25 + $0xb0] ss:$8 sps:$4 sm:$0xff]  }
  0x3e   : > { %1996 = vmatmul.mubr.msk.bf16.gmra.mrb[4].mxu0 %vm212_vm1, %v2117_v62  ;;  %v1375_v57 = vrot.slane %v1373_v47, 5  ;;  %v1356_v59 = vor.u32 %v1355_v10, %v1352_v49  ;;  %v1378_v60 = vshrl.u32 %v1820_v48, 16  ;;  %v1381_v61 = vshll.u32 %v1820_v48, 16  ;;  %v1824_v17 = vld [vmem:[%s2195_s25 + $0x28] sm:$0xf] }
  0x3f   : > { %2001 = vmatprep.mubr.msk.bf16.mxu0 %vm212_vm1, %v2118_v14  ;;  %v524_v36 = vsel %vm2235_vm4, %v519_v33, %v523_v32  ;;  %v1387_v62 = vshll.u32 %v1821_v50, 16  ;;  %v1370_v63 = vor.u32 %v1369_v56, %v1366_v55  ;;  %v1392_v0 = vshrl.u32 %v1822_v51, 16  ;;  %v1825_v20 = vld [vmem:[%s2195_s25 + $0x2c] sm:$0x1]  ;;  %v1826_v21 = vld [vmem:[%s2195_s25 + $0x30] sm:$0xf] }
  0x40   : > { %v1718_v38 = vcombine.low %v510_v1, %v524_v36  ;;  %v1395_v2 = vshll.u32 %v1822_v51, 16  ;;  %v1401_v4 = vshll.u32 %v1823_v58, 16  ;;  %v1357_v6 = vrot.slane %v1356_v59, 4  ;;  %v1827_v22 = vld [vmem:[%s2195_s25 + $0x34] sm:$0x1] }
  0x41   : > { %v1380_v7 = vrot.slane %v1378_v60, 4  ;;  %v1383_v8 = vrot.slane %v1381_v61, 5  ;;  %v1389_v9 = vrot.slane %v1387_v62, 5  ;;  %v1371_v11 = vrot.slane %v1370_v63, 4  ;;  %v2125_v32 = vld [vmem:[%s2195_s25 + $0xc0] ss:$8 sps:$4 sm:$0xff]  }
  0x42   : > { %1956 = vmatmul.mubr.msk.bf16.gmra.mrb[4].mxu1 %vm212_vm1, %v1718_v38  ;;  %v1394_v12 = vrot.slane %v1392_v0, 4  ;;  %v1397_v13 = vrot.slane %v1395_v2, 5  ;;  %v1403_v14 = vrot.slane %v1401_v4, 5  ;;  %v1362_v18 = vsel %vm2235_vm4, %v1357_v6, %v1361_v54  ;;  %v1828_v36 = vld [vmem:[%s2195_s25 + $0x38] sm:$0xf] }
  0x43   : > { %1961 = vmatprep.mubr.msk.bf16.mxu1 %vm212_vm1, %v2120_v37  ;;  %v1384_v19 = vor.u32 %v1383_v8, %v1380_v7  ;;  %v1376_v24 = vsel %vm2235_vm4, %v1371_v11, %v1375_v57  ;;  %v1406_v26 = vshrl.u32 %v1824_v17, 16  ;;  %v1409_v27 = vshll.u32 %v1824_v17, 16  ;;  %v1829_v16 = vld [vmem:[%s2195_s25 + $0x3c] sm:$0x1]  ;;  %v1830_v43 = vld [vmem:[%s2195_s25 + $0x40] sm:$0xf] }
  0x44   : > { %v1398_v25 = vor.u32 %v1397_v13, %v1394_v12  ;;  %v1833_v28 = vcombine.low %v1362_v18, %v1376_v24  ;;  %v1415_v30 = vshll.u32 %v1825_v20, 16  ;;  %v1420_v31 = vshrl.u32 %v1826_v21, 16  ;;  %v1831_v45 = vld [vmem:[%s2195_s25 + $0x44] sm:$0x1]  ;;  %v2126_v15 = vld [vmem:[%s2195_s25 + $0xf8] ss:$8 sps:$4 sm:$0xff]  }
  0x45   : > { %v1385_v29 = vrot.slane %v1384_v19, 4  ;;  %v1408_v33 = vrot.slane %v1406_v26, 4  ;;  %v1434_v23 = vshrl.u32 %v1828_v36, 16  ;;  %v1437_v48 = vshll.u32 %v1828_v36, 16  ;;  %v2127_v8 = vld [vmem:[%s2195_s25 + $0x108] ss:$8 sps:$4 sm:$0xff]  }
  0x46   : > { %2002 = vmatmul.mubr.msk.bf16.vlgmr.msra.gmra.mrb[0].mxu0 %vm212_vm1, %v2119_v35  ;;  %v1399_v1 = vrot.slane %v1398_v25, 4  ;;  %v1423_v35 = vshll.u32 %v1826_v21, 16  ;;  %v1417_v37 = vrot.slane %v1415_v30, 5  ;;  %v1422_v38 = vrot.slane %v1420_v31, 4  ;;  %v1841_v18 = vld [vmem:[%s2419_s2] ss:$0 sm:$0xff] }
  0x47   : > { %2010 = vmatpush3.bf16.msra.mxu0 %v1488_v34  ;;  %2005 = vmatprep.mubr.msk.bf16.mxu0 %vm212_vm1, %v2122_v39  ;;  %v1411_v34 = vrot.slane %v1409_v27, 5  ;;  %v1429_v39 = vshll.u32 %v1827_v22, 16  ;;  %v1443_v49 = vshll.u32 %v1829_v16, 16  ;;  %v1436_v51 = vrot.slane %v1434_v23, 4 }
  0x48   : > { %v1404_v40 = vsel %vm2235_vm4, %v1399_v1, %v1403_v14  ;;  %v1425_v42 = vrot.slane %v1423_v35, 5  ;;  %v1451_v54 = vshll.u32 %v1830_v43, 16  ;;  %v1457_v55 = vshll.u32 %v1831_v45, 16 }
  0x49   : > { %v1412_v41 = vor.u32 %v1411_v34, %v1408_v33  ;;  %v1431_v47 = vrot.slane %v1429_v39, 5  ;;  %v1445_v60 = vrot.slane %v1443_v49, 5 }
  0x4a   : > { %1962 = vmatmul.mubr.msk.bf16.vlgmr.msra.gmra.mrb[0].mxu1 %vm212_vm1, %v2121_v52  ;;  %v1426_v50 = vor.u32 %v1425_v42, %v1422_v38  ;;  %v1448_v52 = vshrl.u32 %v1830_v43, 16  ;;  %v1453_v61 = vrot.slane %v1451_v54, 5  ;;  %v1459_v4 = vrot.slane %v1457_v55, 5 }
  0x4b   : > { %2020 = vmatpush3.bf16.msra.mxu1 %v2178_v3  ;;  %1965 = vmatprep.mubr.msk.bf16.mxu1 %vm212_vm1, %v2124_v5  ;;  %v1390_v3 = vsel %vm2235_vm4, %v1385_v29, %v1389_v9  ;;  %v1413_v10 = vrot.slane %v1412_v41, 4 }
  0x4c   : > { %v1834_v46 = vcombine.low %v1390_v3, %v1404_v40  ;;  %v1427_v57 = vrot.slane %v1426_v50, 4  ;;  %v1450_v58 = vrot.slane %v1448_v52, 4 }
  0x4d   : > { %v1418_v56 = vsel %vm2235_vm4, %v1413_v10, %v1417_v37 }
  0x4e   : > { %2006 = vmatmul.mubr.msk.bf16.gmra.mrb[4].mxu0 %vm212_vm1, %v2123_v53  ;;  %v1439_v53 = vrot.slane %v1437_v48, 5  ;;  %v1432_v62 = vsel %vm2235_vm4, %v1427_v57, %v1431_v47  ;;  %v1454_v2 = vor.u32 %v1453_v61, %v1450_v58 }
  0x4f   : > { %2011 = vmatprep.mubr.msk.bf16.mxu0 %vm212_vm1, %v1833_v28  ;;  %v1835_v63 = vcombine.low %v1418_v56, %v1432_v62 }
  0x50   : > { %v1440_v59 = vor.u32 %v1439_v53, %v1436_v51  ;;  %v1455_v6 = vrot.slane %v1454_v2, 4 }
  0x52   : > { %1966 = vmatmul.mubr.msk.bf16.gmra.mrb[4].mxu1 %vm212_vm1, %v2125_v32  ;;  %v1441_v0 = vrot.slane %v1440_v59, 4  ;;  %v1460_v7 = vsel %vm2235_vm4, %v1455_v6, %v1459_v4 }
  0x53   : > { %1975 = vmatprep.mubr.msk.bf16.mxu1 %vm212_vm1, %v2126_v15 }
  0x54   : > { %v1446_v5 = vsel %vm2235_vm4, %v1441_v0, %v1445_v60 }
  0x55   : > { %v1836_v9 = vcombine.low %v1446_v5, %v1460_v7 }
  0x56   : > { %2012 = vmatmul.mubr.msk.bf16.vlgmr.msra.gmra.mrb[0].mxu0 %vm212_vm1, %v1834_v46 }
  0x57   : > { %2015 = vmatprep.mubr.msk.bf16.mxu0 %vm212_vm1, %v1835_v63 }
  0x5e   : > { %2016 = vmatmul.mubr.msk.bf16.gmra.mrb[4].mxu0 %vm212_vm1, %v1836_v9  ;;  %1976 = vmatmul.mubr.msk.bf16.vlgmr.msra.gmra.mrb[4].mxu1 %vm212_vm1, %v2127_v8 }
 0x11d   : > { %v1963_v11 = vpop.f32.mrb[0].mxu1 }
 0x11e   : > { %v707_v12 = vpop.f32.mrb[1].mxu1 }
 0x11f   : > { %v1964_v13 = vpop.f32.mrb[2].mxu1 }
 0x120   : > { %v710_v14 = vpop.f32.mrb[3].mxu1 }
 0x129   : > { %v2013_v17 = vpop.f32.mrb[0].mxu0 }
 0x12a   : > { %v2021_v19 = vadd.f32 %v2013_v17, %v1963_v11  ;;  %v1524_v20 = vpop.f32.mrb[1].mxu0 }
 0x12b   : > { %v2022_v44 = vadd.f32 %v1524_v20, %v707_v12  ;;  %v2014_v21 = vpop.f32.mrb[2].mxu0 }
 0x12c   : > { %v1572_v22 = vadd.f32 %v2021_v19, %v1841_v18  ;;  %v2023_v24 = vadd.f32 %v2014_v21, %v1964_v13  ;;  %v1527_v25 = vpop.f32.mrb[3].mxu0 }
 0x12d   : > { %v1570_v26 = vadd.f32 %v2022_v44, %v1841_v18  ;;  %v2024_v27 = vadd.f32 %v1527_v25, %v710_v14 }
 0x12e   : > { %v1573_v28 = vadd.f32 %v2023_v24, %v1841_v18  ;;  %v1580_v30 = vmax.f32 %v1572_v22, 0.0 }
 0x12f   : > { %v1571_v29 = vadd.f32 %v2024_v27, %v1841_v18  ;;  %v1578_v32 = vmax.f32 %v1570_v26, 0.0 }
 0x130   : > { %v1581_v31 = vmax.f32 %v1573_v28, 0.0 }
 0x131   : > { %v1579_v1 = vmax.f32 %v1571_v29, 0.0  ;;  %v2017_v35 = vpop.f32.mrb[4].mxu0  ;;  %v1977_v3 = vpop.f32.mrb[4].mxu1 }
 0x132   : > { %v1869_v33 = vpack.c.bf16 %v1581_v31, %v1580_v30  ;;  %v1540_v36 = vpop.f32.mrb[5].mxu0  ;;  %v2025_v38 = vadd.f32 %v2017_v35, %v1977_v3  ;;  %v842_v39 = vpop.f32.mrb[5].mxu1 }
 0x133   : > { %v1864_v34 = vpack.c.bf16 %v1579_v1, %v1578_v32  ;;  %v2018_v37 = vpop.f32.mrb[6].mxu0  ;;  %v2026_v40 = vadd.f32 %v1540_v36, %v842_v39  ;;  %v1978_v41 = vpop.f32.mrb[6].mxu1 }
 0x134   : > { %1881 = vst [vmem:[%s170_s16 + $0x8] sm:$0xff] %v1869_v33   ;;  %v1543_v16 = vpop.f32.mrb[7].mxu0  ;;  %v1576_v42 = vadd.f32 %v2025_v38, %v1841_v18  ;;  %v2027_v43 = vadd.f32 %v2018_v37, %v1978_v41  ;;  %v845_v45 = vpop.f32.mrb[7].mxu1 }
 0x135   : > { %1865 = vst [vmem:[%s170_s16] sm:$0xff] %v1864_v34   ;;  %v1574_v23 = vadd.f32 %v2026_v40, %v1841_v18  ;;  %v2028_v46 = vadd.f32 %v1543_v16, %v845_v45 }
 0x136   : > { %v1577_v15 = vadd.f32 %v2027_v43, %v1841_v18  ;;  %v1584_v48 = vmax.f32 %v1576_v42, 0.0 }
 0x137   : > { %v1575_v47 = vadd.f32 %v2028_v46, %v1841_v18  ;;  %v1582_v10 = vmax.f32 %v1574_v23, 0.0 }
 0x138   : > { %v1585_v49 = vmax.f32 %v1577_v15, 0.0 }
 0x139   : > { %v1583_v50 = vmax.f32 %v1575_v47, 0.0 }
 0x13a   : > { %v1879_v51 = vpack.c.bf16 %v1585_v49, %v1584_v48 }
 0x13b   : > { %v1874_v52 = vpack.c.bf16 %v1583_v50, %v1582_v10 }
 0x13c   : > { %1883 = vst [vmem:[%s170_s16 + $0x18] sm:$0xff] %v1879_v51  }
 0x13d   : > { %1882 = vst [vmem:[%s170_s16 + $0x10] sm:$0xff] %v1874_v52  }
 0x13e PF: > { %s13_s12 = sadd.s32 1, %s2134_s12  }
 0x13f   : > { %p10_p4 = scmp.ge.s32.totalorder %s13_s12, 4  }
 0x141   :  { %12 = sbr.rel (!%p10_p4) target bundleno = 1 (0x1), region = 75 }

// kernel: basic_block_forward.4
= control target key start
LH: loop header
LB: loop body
LE: loop exit
PB: predicated region body
PF: predicated region fallthrough
CT: control target
= control target key end

     0   :  { %s434_s12 = smov 0   ;;  %s457_s0 = inlined_call_operand.vmem [shape: bf16[2,1,8,8,4], index: 0, kind: input, shape index: {}]   ;;  %s458_s1 = inlined_call_operand.vmem [shape: bf16[1,4,128], index: 1, kind: input, shape index: {}]   ;;  %s459_s2 = inlined_call_operand.vmem [shape: f32[1,128], index: 2, kind: input, shape index: {}]   ;;  %s460_s3 = inlined_call_operand.vmem [shape: f32[2,64,128], index: 3, kind: output, shape index: {}]  }
   0x1 LB: > { %s353_s13 = sadd.s32 4294967295, %s412_s12   ;;  %p357_p0 = scmp.ge.s32.totalorder %s412_s12, 1  ;;  %s412_s12 = sphi %s434_s12, %s13_s12  }
   0x2   : > { %p137_p1 = scmp.lt.s32.totalorder %s412_s12, 3 }
   0x4   : > { %p138_p2 = pnand %p357_p0, %p137_p1 }
   0x5   : > { %v180_v0 = vld [vmem:[%s458_s1] sm:$0x3] (!%p138_p2)  ;;  %vm221_vm0 = vcmask (!%p138_p2), 1041408   ;;  %p161_p3 = scmp.lt.s32.totalorder (!%p138_p2), %s353_s13, 1  ;;  %vm208_vm1 = vcmask (!%p138_p2), 31744  }
   0x6   : > { %141 = sbr.rel (%p138_p2) target bundleno = 236 (0xec), region = 32  ;;  %392 = vmatprep.subr.msk.bf16.mxu0 (!%p138_p2), %vm221_vm0, %v180_v0  ;;  %393 = vmatprep.subr.msk.bf16.mxu1 (!%p138_p2), %vm221_vm0, %v180_v0  ;;  %v223_v1 = vsel (!%p138_p2), %vm221_vm0, %v180_v0, 0  ;;  %v362_v6 = vld [vmem:[%s459_s2] ss:$0 sm:$0xff] (!%p138_p2) }
   0x7   : > { %381 = vmatpush3.bf16.msra.mxu0 (!%p138_p2), %v223_v1  ;;  %391 = vmatpush3.bf16.msra.mxu1 (!%p138_p2), %v223_v1 }
   0xd   : > { %s462_s13 = smov (!%p161_p3, %s353_s13), 1 }
   0xe   : > { %s373_s16 = sshll.u32 %s462_s13, 5  ;;  %s374_s20 = sshll.u32 %s462_s13, 6 }
   0xf   : > { %s165_s19 = scalar_lea.vmem %s457_s0, %s373_s16  ;;  %s170_s25 = scalar_lea.vmem %s460_s3, %s374_s20 }
  0x10   : > { %v402_v2 = vld [vmem:[%s165_s19] sm:$0xff]   ;;  %v403_v3 = vld [vmem:[%s165_s19 + $0x10] sm:$0xff]   ;;  %v404_v4 = vld [vmem:[%s165_s19 + $0x8] sm:$0xff]  }
  0x11   : > { %382 = vmatprep.mubr.msk.bf16.mxu0 %vm208_vm1, %v402_v2  ;;  %386 = vmatprep.mubr.msk.bf16.mxu1 %vm208_vm1, %v403_v3  ;;  %v405_v5 = vld [vmem:[%s165_s19 + $0x18] sm:$0xff]  }
  0x12   : > { %383 = vmatmul.mubr.msk.bf16.vlgmr.msra.gmra.mrb[0].mxu0 %vm208_vm1, %v404_v4  ;;  %387 = vmatmul.mubr.msk.bf16.vlgmr.msra.gmra.mrb[0].mxu1 %vm208_vm1, %v405_v5 }
  0xe5   : > { %v384_v7 = vpop.f32.mrb[0].mxu0  ;;  %v388_v9 = vpop.f32.mrb[0].mxu1 }
  0xe6   : > { %v268_v8 = vadd.f32 %v384_v7, %v362_v6  ;;  %v259_v10 = vpop.f32.mrb[1].mxu0  ;;  %v284_v11 = vadd.f32 %v388_v9, %v362_v6  ;;  %v275_v13 = vpop.f32.mrb[1].mxu1 }
  0xe7   : > { %v260_v12 = vadd.f32 %v362_v6, %v259_v10  ;;  %v385_v14 = vpop.f32.mrb[2].mxu0  ;;  %v276_v15 = vadd.f32 %v362_v6, %v275_v13  ;;  %v389_v17 = vpop.f32.mrb[2].mxu1 }
  0xe8   : > { %292 = vst [vmem:[%s170_s25 + $0x10] sm:$0xff] %v268_v8  ;;  %v271_v16 = vadd.f32 %v385_v14, %v362_v6  ;;  %v262_v18 = vpop.f32.mrb[3].mxu0  ;;  %296 = vst [vmem:[%s170_s25 + $0x30] sm:$0xff] %v284_v11  ;;  %v287_v19 = vadd.f32 %v389_v17, %v362_v6  ;;  %v278_v21 = vpop.f32.mrb[3].mxu1 }
  0xe9   : > { %290 = vst [vmem:[%s170_s25] sm:$0xff] %v260_v12  ;;  %v263_v20 = vadd.f32 %v362_v6, %v262_v18  ;;  %294 = vst [vmem:[%s170_s25 + $0x20] sm:$0xff] %v276_v15  ;;  %v279_v22 = vadd.f32 %v362_v6, %v278_v21 }
  0xea   : > { %293 = vst [vmem:[%s170_s25 + $0x18] sm:$0xff] %v271_v16  ;;  %297 = vst [vmem:[%s170_s25 + $0x38] sm:$0xff] %v287_v19 }
  0xeb   : > { %291 = vst [vmem:[%s170_s25 + $0x8] sm:$0xff] %v263_v20  ;;  %295 = vst [vmem:[%s170_s25 + $0x28] sm:$0xff] %v279_v22 }
  0xec PF: > { %s13_s12 = sadd.s32 1, %s412_s12  }
  0xed   : > { %p10_p4 = scmp.ge.s32.totalorder %s13_s12, 4  }
  0xef   :  { %12 = sbr.rel (!%p10_p4) target bundleno = 1 (0x1), region = 62 }

// kernel: basic_block_forward.5
= control target key start
LH: loop header
LB: loop body
LE: loop exit
PB: predicated region body
PF: predicated region fallthrough
CT: control target
= control target key end

     0   :  { %s3171_s15 = smov 0   ;;  %s3766_s0 = inlined_call_operand.vmem [shape: bf16[2,1,10,10,128], index: 0, kind: input, shape index: {}]   ;;  %s3767_s1 = inlined_call_operand.vmem [shape: bf16[9,128,128], index: 1, kind: input, shape index: {}]   ;;  %s3768_s2 = inlined_call_operand.vmem [shape: f32[1,128], index: 2, kind: input, shape index: {}]   ;;  %s3769_s3 = inlined_call_operand.vmem [shape: f32[2,64,128], index: 3, kind: input, shape index: {}, may-alias: {3,4}]   ;;  %s3770_s4 = inlined_call_operand.vmem [shape: f32[2,64,128], index: 4, kind: output, shape index: {}, may-alias: {3,4}]  }
   0x1 LB: > { %s2302_s16 = sadd.s32 4294967295, %s3144_s15   ;;  %p2306_p0 = scmp.ge.s32.totalorder %s3144_s15, 1  ;;  %s3144_s15 = sphi %s3171_s15, %s14_s15  }
   0x2   : > { %p172_p1 = scmp.lt.s32.totalorder %s3144_s15, 3 }
   0x4   : > { %p173_p2 = pnand %p2306_p0, %p172_p1 }
   0x5   : > { %v3054_v0 = vld [vmem:[%s3767_s1 + $0x40] sm:$0xff] (!%p173_p2)   ;;  %p203_p3 = scmp.lt.s32.totalorder (!%p173_p2), %s2302_s16, 1  ;;  %v3056_v2 = vld [vmem:[%s3767_s1 + $0x48] sm:$0xff] (!%p173_p2)   ;;  %v3058_v4 = vld [vmem:[%s3767_s1 + $0x50] sm:$0xff] (!%p173_p2)   ;;  %vm251_vm0 = vsmask.f32 (!%p173_p2), 3328 }
   0x6   : > { %176 = sbr.rel (%p173_p2) target bundleno = 396 (0x18c), region = 36  ;;  %v3055_v1 = vld [vmem:[%s3767_s1 + $0x100] sm:$0xff] (!%p173_p2)   ;;  %2749 = vmatprep.subr.bf16.mxu1 (!%p173_p2), %v3054_v0  ;;  %v3057_v3 = vld [vmem:[%s3767_s1 + $0x108] sm:$0xff] (!%p173_p2)   ;;  %v3059_v5 = vld [vmem:[%s3767_s1 + $0x110] sm:$0xff] (!%p173_p2)   ;;  %vm252_vm1 = vsmask.f32 (!%p173_p2), 7440 }
   0x7   : > { %2845 = vmatprep.subr.bf16.mxu0 (!%p173_p2), %v3055_v1  ;;  %2750 = vmatpush3.bf16.msra.mxu1 (!%p173_p2), %v3054_v0  ;;  %v3060_v6 = vld [vmem:[%s3767_s1 + $0x58] sm:$0xff] (!%p173_p2)   ;;  %v3062_v8 = vld [vmem:[%s3767_s1 + $0x60] sm:$0xff] (!%p173_p2)   ;;  %v3064_v10 = vld [vmem:[%s3767_s1 + $0x68] sm:$0xff] (!%p173_p2)   ;;  %vm673_vm3 = vcmask (!%p173_p2), 1042432   ;;  %vm674_vm4 = vcmask (!%p173_p2), 1046532  }
   0x8   : > { %2846 = vmatpush3.bf16.msra.mxu0 (!%p173_p2), %v3055_v1  ;;  %2751 = vmatprep.subr.bf16.mxu1 (!%p173_p2), %v3056_v2  ;;  %v3061_v7 = vld [vmem:[%s3767_s1 + $0x118] sm:$0xff] (!%p173_p2)   ;;  %v3063_v9 = vld [vmem:[%s3767_s1 + $0x120] sm:$0xff] (!%p173_p2)   ;;  %v3065_v14 = vld [vmem:[%s3767_s1 + $0x128] sm:$0xff] (!%p173_p2)  }
   0x9   : > { %2847 = vmatprep.subr.bf16.mxu0 (!%p173_p2), %v3057_v3  ;;  %v3066_v22 = vld [vmem:[%s3767_s1 + $0x70] sm:$0xff] (!%p173_p2)   ;;  %v3068_v37 = vld [vmem:[%s3767_s1 + $0x78] sm:$0xff] (!%p173_p2)   ;;  %vm3260_vm2 = vmor (!%p173_p2), %vm251_vm0, %vm252_vm1 }
   0xa   : > { %v3067_v23 = vld [vmem:[%s3767_s1 + $0x130] sm:$0xff] (!%p173_p2)   ;;  %v3069_v47 = vld [vmem:[%s3767_s1 + $0x138] sm:$0xff] (!%p173_p2)   ;;  %v3070_v63 = vld [vmem:[%s3767_s1] sm:$0xff] (!%p173_p2)  }
   0xb   : > { %2752 = vmatpush3.bf16.msra.mxu1 (!%p173_p2), %v3056_v2  ;;  %v3292_v1 = vld [vmem:[%s3767_s1 + $0x140] sm:$0xff] (!%p173_p2)   ;;  %vm3434_vm5 = vmor (!%p173_p2), %vm673_vm3, %vm674_vm4 }
   0xc   : > { %2848 = vmatpush3.bf16.msra.mxu0 (!%p173_p2), %v3057_v3  ;;  %2753 = vmatprep.subr.bf16.mxu1 (!%p173_p2), %v3058_v4  ;;  %v3134_v38 = vld [vmem:[%s3767_s1 + $0x220] sm:$0xff] (!%p173_p2)  }
   0xd   : > { %s3776_s16 = smov (!%p203_p3, %s2302_s16), 1  ;;  %2849 = vmatprep.subr.bf16.mxu0 %v3059_v5 }
   0xe   : > { %s3045_s7 = smul.u32 80, %s3776_s16 }
   0xf   : > { %2754 = vmatpush3.bf16.msra.mxu1 %v3058_v4 }
  0x10   : > { %2850 = vmatpush3.bf16.msra.mxu0 %v3059_v5  ;;  %2755 = vmatprep.subr.bf16.mxu1 %v3060_v6  ;;  %s3215_s14 = scalar_lea.vmem %s3766_s0, %s3045_s7 }
  0x11   : > { %2851 = vmatprep.subr.bf16.mxu0 %v3061_v7  ;;  %v3221_v11 = vld [vmem:[%s3215_s14] sm:$0xf]  ;;  %v3224_v12 = vld [vmem:[%s3215_s14 + $0x8] sm:$0xf]  ;;  %v3227_v13 = vld [vmem:[%s3215_s14 + $0x4] sm:$0x1] }
  0x12   : > { %v3233_v15 = vld [vmem:[%s3215_s14 + $0xc] sm:$0x1]  ;;  %v255_v16 = vshrl.u32 %v3221_v11, 16  ;;  %v258_v17 = vshll.u32 %v3221_v11, 16  ;;  %v264_v18 = vshll.u32 %v3227_v13, 16  ;;  %v269_v19 = vshrl.u32 %v3224_v12, 16 }
  0x13   : > { %2756 = vmatpush3.bf16.msra.mxu1 %v3060_v6  ;;  %v272_v20 = vshll.u32 %v3224_v12, 16  ;;  %v278_v21 = vshll.u32 %v3233_v15, 16  ;;  %v2424_v30 = vld [vmem:[%s3215_s14 + $0x8] sm:$0xf]  ;;  %v3249_v31 = vld [vmem:[%s3215_s14 + $0xc] sm:$0x1] }
  0x14   : > { %2852 = vmatpush3.bf16.msra.mxu0 %v3061_v7  ;;  %2757 = vmatprep.subr.bf16.mxu1 %v3062_v8  ;;  %v257_v24 = vrot.slane %v255_v16, 4  ;;  %v260_v25 = vrot.slane %v258_v17, 5  ;;  %v266_v26 = vrot.slane %v264_v18, 5  ;;  %v271_v27 = vrot.slane %v269_v19, 4  ;;  %v2426_v33 = vld [vmem:[%s3215_s14 + $0x10] sm:$0xf] }
  0x15   : > { %2853 = vmatprep.subr.bf16.mxu0 %v3063_v9  ;;  %v274_v28 = vrot.slane %v272_v20, 5  ;;  %v280_v29 = vrot.slane %v278_v21, 5  ;;  %v3253_v34 = vld [vmem:[%s3215_s14 + $0x14] sm:$0x1]  ;;  %v1050_v35 = vshrl.u32 %v2424_v30, 16  ;;  %v1053_v36 = vshll.u32 %v2424_v30, 16 }
  0x16   : > { %v261_v32 = vor.u32 %v260_v25, %v257_v24  ;;  %v1059_v40 = vshll.u32 %v3249_v31, 16  ;;  %v1064_v41 = vshrl.u32 %v2426_v33, 16  ;;  %v1067_v42 = vshll.u32 %v2426_v33, 16  ;;  %v3270_v51 = vld [vmem:[%s3215_s14 + $0x10] sm:$0xf] }
  0x17   : > { %2758 = vmatpush3.bf16.msra.mxu1 %v3062_v8  ;;  %v275_v39 = vor.u32 %v274_v28, %v271_v27  ;;  %v1052_v44 = vrot.slane %v1050_v35, 4  ;;  %v1055_v45 = vrot.slane %v1053_v36, 5  ;;  %v1073_v46 = vshll.u32 %v3253_v34, 16  ;;  %v3275_v55 = vld [vmem:[%s3215_s14 + $0x18] sm:$0xf] }
  0x18   : > { %2854 = vmatpush3.bf16.msra.mxu0 %v3063_v9  ;;  %2759 = vmatprep.subr.bf16.mxu1 %v3064_v10  ;;  %v262_v43 = vrot.slane %v261_v32, 4  ;;  %v1066_v49 = vrot.slane %v1064_v41, 4  ;;  %v1069_v50 = vrot.slane %v1067_v42, 5  ;;  %v1061_v54 = vrot.slane %v1059_v40, 5  ;;  %v3278_v56 = vld [vmem:[%s3215_s14 + $0x14] sm:$0x1] }
  0x19   : > { %2855 = vmatprep.subr.bf16.mxu0 %v3065_v14  ;;  %v276_v48 = vrot.slane %v275_v39, 4  ;;  %v1056_v53 = vor.u32 %v1055_v45, %v1052_v44  ;;  %v1075_v59 = vrot.slane %v1073_v46, 5  ;;  %v3283_v60 = vld [vmem:[%s3215_s14 + $0x1c] sm:$0x1]  ;;  %v283_v61 = vshrl.u32 %v3270_v51, 16 }
  0x1a   : > { %v267_v52 = vsel %vm3260_vm2, %v262_v43, %v266_v26  ;;  %v1070_v58 = vor.u32 %v1069_v50, %v1066_v49  ;;  %v286_v2 = vshll.u32 %v3270_v51, 16  ;;  %v292_v3 = vshll.u32 %v3278_v56, 16  ;;  %v2428_v8 = vld [vmem:[%s3215_s14 + $0x18] sm:$0xf]  ;;  %v3303_v16 = vld [vmem:[%s3215_s14 + $0x1c] sm:$0x1] }
  0x1b   : > { %2760 = vmatpush3.bf16.msra.mxu1 %v3064_v10  ;;  %v281_v57 = vsel %vm3260_vm2, %v276_v48, %v280_v29  ;;  %v1057_v0 = vrot.slane %v1056_v53, 4  ;;  %v285_v5 = vrot.slane %v283_v61, 4  ;;  %v297_v6 = vshrl.u32 %v3275_v55, 16  ;;  %v2430_v17 = vld [vmem:[%s3215_s14 + $0x20] sm:$0xf]  ;;  %v3072_v43 = vld [vmem:[%s3767_s1 + $0x8] sm:$0xff]  }
  0x1c   : > { %2856 = vmatpush3.bf16.msra.mxu0 %v3065_v14  ;;  %2761 = vmatprep.subr.bf16.mxu1 %v3066_v22  ;;  %v2328_v62 = vcombine.low %v267_v52, %v281_v57  ;;  %v1071_v4 = vrot.slane %v1070_v58, 4  ;;  %v300_v7 = vshll.u32 %v3275_v55, 16  ;;  %v288_v10 = vrot.slane %v286_v2, 5  ;;  %v3309_v21 = vld [vmem:[%s3215_s14 + $0x24] sm:$0x1] }
  0x1d   : > { %2857 = vmatprep.subr.bf16.mxu0 %v3067_v23  ;;  %v1062_v9 = vsel %vm3260_vm2, %v1057_v0, %v1061_v54  ;;  %v306_v14 = vshll.u32 %v3283_v60, 16  ;;  %v299_v19 = vrot.slane %v297_v6, 4  ;;  %v294_v24 = vrot.slane %v292_v3, 5  ;;  %v3073_v54 = vld [vmem:[%s3767_s1 + $0x148] sm:$0xff]   ;;  %v3339_v0 = vld [vmem:[%s3215_s14 + $0x24] sm:$0x1] }
  0x1e   : > { %2765 = vmatprep.mubr.bf16.mxu1 %v2328_v62  ;;  %v1076_v18 = vsel %vm3260_vm2, %v1071_v4, %v1075_v59  ;;  %v302_v20 = vrot.slane %v300_v7, 5  ;;  %v1078_v27 = vshrl.u32 %v2428_v8, 16  ;;  %v1081_v28 = vshll.u32 %v2428_v8, 16  ;;  %v3074_v59 = vld [vmem:[%s3767_s1 + $0x10] sm:$0xff]   ;;  %v3333_v62 = vld [vmem:[%s3215_s14 + $0x20] sm:$0xf] }
  0x1f   : > { %2762 = vmatpush3.bf16.msra.mxu1 %v3066_v22  ;;  %v2456_v22 = vcombine.low %v1062_v9, %v1076_v18  ;;  %v308_v25 = vrot.slane %v306_v14, 5  ;;  %v1087_v29 = vshll.u32 %v3303_v16, 16  ;;  %v1092_v32 = vshrl.u32 %v2430_v17, 16  ;;  %v3342_v2 = vld [vmem:[%s3215_s14 + $0x2c] sm:$0x1]  ;;  %v3075_v9 = vld [vmem:[%s3767_s1 + $0x150] sm:$0xff]  }
  0x20   : > { %2858 = vmatpush3.bf16.msra.mxu0 %v3067_v23  ;;  %2763 = vmatprep.subr.bf16.mxu1 %v3068_v37  ;;  %v289_v23 = vor.u32 %v288_v10, %v285_v5  ;;  %v303_v26 = vor.u32 %v302_v20, %v299_v19  ;;  %v1095_v33 = vshll.u32 %v2430_v17, 16  ;;  %v1101_v35 = vshll.u32 %v3309_v21, 16  ;;  %v3076_v10 = vld [vmem:[%s3767_s1 + $0x18] sm:$0xff]  }
  0x21   : > { %2859 = vmatprep.subr.bf16.mxu0 %v3069_v47  ;;  %2861 = vmatprep.mubr.bf16.mxu0 %v2456_v22  ;;  %v1083_v39 = vrot.slane %v1081_v28, 5  ;;  %v1094_v41 = vrot.slane %v1092_v32, 4  ;;  %v1089_v46 = vrot.slane %v1087_v29, 5  ;;  %v1341_v57 = vrot.slane %v3249_v31, 5  ;;  %v3077_v29 = vld [vmem:[%s3767_s1 + $0x158] sm:$0xff]  }
  0x22   : > { %v290_v30 = vrot.slane %v289_v23, 4  ;;  %v304_v36 = vrot.slane %v303_v26, 4  ;;  %v1097_v42 = vrot.slane %v1095_v33, 5  ;;  %v311_v3 = vshrl.u32 %v3333_v62, 16  ;;  %v2432_v23 = vld [vmem:[%s3215_s14 + $0x28] sm:$0xf] }
  0x23   : > { %2764 = vmatpush3.bf16.msra.mxu1 %v3068_v37  ;;  %v1080_v37 = vrot.slane %v1078_v27, 4  ;;  %v314_v4 = vshll.u32 %v3333_v62, 16  ;;  %v320_v5 = vshll.u32 %v3339_v0, 16  ;;  %v334_v8 = vshll.u32 %v3342_v2, 16  ;;  %v3363_v26 = vld [vmem:[%s3215_s14 + $0x34] sm:$0x1] }
  0x24   : > { %2860 = vmatpush3.bf16.msra.mxu0 %v3069_v47  ;;  %2773 = vmatprep.subr.bf16.mxu1 %v3070_v63  ;;  %v295_v40 = vsel %vm3260_vm2, %v290_v30, %v294_v24  ;;  %v309_v44 = vsel %vm3260_vm2, %v304_v36, %v308_v25  ;;  %v1103_v47 = vrot.slane %v1101_v35, 5  ;;  %v1098_v49 = vor.u32 %v1097_v42, %v1094_v41  ;;  %v3359_v24 = vld [vmem:[%s3215_s14 + $0x2c] sm:$0x1]  ;;  %v2434_v25 = vld [vmem:[%s3215_s14 + $0x30] sm:$0xf]  ;;  %v3078_v30 = vld [vmem:[%s3767_s1 + $0x20] sm:$0xff]  }
  0x25   : > { %2869 = vmatprep.subr.bf16.mxu0 %v3292_v1  ;;  %v1084_v45 = vor.u32 %v1083_v39, %v1080_v37  ;;  %v2329_v48 = vcombine.low %v295_v40, %v309_v44  ;;  %v313_v14 = vrot.slane %v311_v3, 4  ;;  %v316_v17 = vrot.slane %v314_v4, 5 }
  0x26   : > { %v1099_v52 = vrot.slane %v1098_v49, 4  ;;  %v322_v18 = vrot.slane %v320_v5, 5  ;;  %v336_v22 = vrot.slane %v334_v8, 5  ;;  %v1106_v27 = vshrl.u32 %v2432_v23, 16  ;;  %v2436_v5 = vld [vmem:[%s3215_s14 + $0x38] sm:$0xf] }
  0x27   : > { %v1085_v50 = vrot.slane %v1084_v45, 4  ;;  %2766 = vmatmul.mubr.bf16.vlgmr.msra.gmra.mrb[0].mxu1 %v2329_v48  ;;  %v1109_v28 = vshll.u32 %v2432_v23, 16  ;;  %v1115_v33 = vshll.u32 %v3359_v24, 16  ;;  %v1120_v35 = vshrl.u32 %v2434_v25, 16 }
  0x28   : > { %2774 = vmatpush3.bf16.msra.mxu1 %v3070_v63  ;;  %v1104_v58 = vsel %vm3260_vm2, %v1099_v52, %v1103_v47  ;;  %v3336_v63 = vld [vmem:[%s3215_s14 + $0x28] sm:$0xf]  ;;  %v1123_v36 = vshll.u32 %v2434_v25, 16  ;;  %v1108_v39 = vrot.slane %v1106_v27, 4  ;;  %v1129_v41 = vshll.u32 %v3363_v26, 16 }
  0x29   : > { %v1090_v53 = vsel %vm3260_vm2, %v1085_v50, %v1089_v46  ;;  %2775 = vmatprep.subr.bf16.mxu1 %v3072_v43  ;;  %v325_v6 = vshrl.u32 %v3336_v63, 16  ;;  %v328_v7 = vshll.u32 %v3336_v63, 16  ;;  %v1111_v40 = vrot.slane %v1109_v28, 5  ;;  %v3374_v46 = vld [vmem:[%s3215_s14 + $0x30] sm:$0xf] }
  0x2a   : > { %v2457_v61 = vcombine.low %v1090_v53, %v1104_v58  ;;  %v1122_v44 = vrot.slane %v1120_v35, 4  ;;  %v1125_v45 = vrot.slane %v1123_v36, 5  ;;  %v1131_v49 = vrot.slane %v1129_v41, 5  ;;  %v3379_v50 = vld [vmem:[%s3215_s14 + $0x38] sm:$0xf] }
  0x2b   : > { %v327_v19 = vrot.slane %v325_v6, 4  ;;  %v330_v20 = vrot.slane %v328_v7, 5  ;;  %v1112_v48 = vor.u32 %v1111_v40, %v1108_v39  ;;  %v3382_v52 = vld [vmem:[%s3215_s14 + $0x34] sm:$0x1]  ;;  %v339_v53 = vshrl.u32 %v3374_v46, 16  ;;  %v3080_v6 = vld [vmem:[%s3767_s1 + $0x28] sm:$0xff]  }
  0x2c   : > { %2862 = vmatmul.mubr.bf16.vlgmr.msra.gmra.mrb[0].mxu0 %v2457_v61  ;;  %2776 = vmatpush3.bf16.msra.mxu1 %v3072_v43  ;;  %v1117_v43 = vrot.slane %v1115_v33, 5  ;;  %v3391_v61 = vld [vmem:[%s3215_s14 + $0x3c] sm:$0x1]  ;;  %v342_v3 = vshll.u32 %v3374_v46, 16  ;;  %v348_v4 = vshll.u32 %v3382_v52, 16  ;;  %v1134_v28 = vshrl.u32 %v2436_v5, 16 }
  0x2d   : > { %2870 = vmatpush3.bf16.msra.mxu0 %v3292_v1  ;;  %2777 = vmatprep.subr.bf16.mxu1 %v3074_v59  ;;  %v317_v1 = vor.u32 %v316_v17, %v313_v14  ;;  %v331_v32 = vor.u32 %v330_v20, %v327_v19  ;;  %v1113_v8 = vrot.slane %v1112_v48, 4  ;;  %v353_v14 = vshrl.u32 %v3379_v50, 16  ;;  %v3401_v17 = vld [vmem:[%s3215_s14 + $0x3c] sm:$0x1]  ;;  %v3409_v27 = vld [vmem:[%s3215_s14 + $0x44] sm:$0x1] }
  0x2e   : > { %2871 = vmatprep.subr.bf16.mxu0 %v3073_v54  ;;  %v344_v19 = vrot.slane %v342_v3, 5  ;;  %v350_v20 = vrot.slane %v348_v4, 5  ;;  %v362_v25 = vshll.u32 %v3391_v61, 16  ;;  %v1137_v36 = vshll.u32 %v2436_v5, 16 }
  0x2f   : > { %v318_v37 = vrot.slane %v317_v1, 4  ;;  %v332_v42 = vrot.slane %v331_v32, 4  ;;  %v1118_v23 = vsel %vm3260_vm2, %v1113_v8, %v1117_v43  ;;  %v355_v1 = vrot.slane %v353_v14, 4 }
  0x30   : > { %2778 = vmatpush3.bf16.msra.mxu1 %v3074_v59  ;;  %v1126_v59 = vor.u32 %v1125_v45, %v1122_v44  ;;  %v364_v40 = vrot.slane %v362_v25, 5  ;;  %v1136_v41 = vrot.slane %v1134_v28, 4  ;;  %v1139_v45 = vrot.slane %v1137_v36, 5  ;;  %v2470_v25 = vld [vmem:[%s3215_s14 + $0x18] sm:$0xe] }
  0x31   : > { %2872 = vmatpush3.bf16.msra.mxu0 %v3073_v54  ;;  %2779 = vmatprep.subr.bf16.mxu1 %v3076_v10  ;;  %v323_v47 = vsel %vm3260_vm2, %v318_v37, %v322_v18  ;;  %v3079_v54 = vld [vmem:[%s3767_s1 + $0x160] sm:$0xff]   ;;  %v337_v58 = vsel %vm3260_vm2, %v332_v42, %v336_v22  ;;  %v356_v22 = vshll.u32 %v3379_v50, 16  ;;  %v3082_v37 = vld [vmem:[%s3767_s1 + $0x30] sm:$0xff]   ;;  %v1143_v42 = vshll.u32 %v3401_v17, 16  ;;  %v3085_v28 = vld [vmem:[%s3767_s1 + $0x178] sm:$0xff]  }
  0x32   : > { %2873 = vmatprep.subr.bf16.mxu0 %v3075_v9  ;;  %v2330_v7 = vcombine.low %v323_v47, %v337_v58  ;;  %v1127_v18 = vrot.slane %v1126_v59, 4  ;;  %v1345_v47 = vrot.slane %v3253_v34, 5  ;;  %v1349_v48 = vrot.slane %v3303_v16, 5  ;;  %v3083_v58 = vld [vmem:[%s3767_s1 + $0x170] sm:$0xff]  }
  0x33   : > { %v358_v35 = vrot.slane %v356_v22, 5  ;;  %v1140_v4 = vor.u32 %v1139_v45, %v1136_v41  ;;  %v1145_v34 = vrot.slane %v1143_v42, 5  ;;  %v1353_v22 = vrot.slane %v3309_v21, 5  ;;  %v3088_v41 = vld [vmem:[%s3767_s1 + $0x180] sm:$0xff]  }
  0x34   : > { %2780 = vmatpush3.bf16.msra.mxu1 %v3076_v10  ;;  %v341_v10 = vrot.slane %v339_v53, 4  ;;  %2769 = vmatprep.mubr.bf16.mxu1 %v2330_v7  ;;  %v1132_v32 = vsel %vm3260_vm2, %v1127_v18, %v1131_v49  ;;  %v1157_v53 = vshll.u32 %v3409_v27, 16  ;;  %v2468_v7 = vld [vmem:[%s3215_s14 + $0x8] sm:$0xe]  ;;  %v2478_v36 = vrot.slane %v2470_v25, 9 }
  0x35   : > { %2874 = vmatpush3.bf16.msra.mxu0 %v3075_v9  ;;  %2781 = vmatprep.subr.bf16.mxu1 %v3078_v30  ;;  %v2438_v9 = vld [vmem:[%s3215_s14 + $0x40] sm:$0xf]  ;;  %v2458_v39 = vcombine.low %v1118_v23, %v1132_v32  ;;  %v359_v44 = vor.u32 %v358_v35, %v355_v1  ;;  %v2476_v14 = vrot.slane %v2468_v7, 9  ;;  %v1141_v18 = vrot.slane %v1140_v4, 4 }
  0x36   : > { %2875 = vmatprep.subr.bf16.mxu0 %v3077_v29  ;;  %v345_v33 = vor.u32 %v344_v19, %v341_v10  ;;  %v1151_v49 = vshll.u32 %v2438_v9, 16  ;;  %v2469_v10 = vld [vmem:[%s3215_s14 + $0x10] sm:$0xe]  ;;  %v2340_v19 = vcombine.low %v3221_v11, %v3224_v12  ;;  %v1159_v1 = vrot.slane %v1157_v53, 5  ;;  %v2471_v12 = vld [vmem:[%s3215_s14 + $0x20] sm:$0xe] }
  0x37   : > { %2865 = vmatprep.mubr.bf16.mxu0 %v2458_v39  ;;  %v360_v3 = vrot.slane %v359_v44, 4  ;;  %v1342_v32 = vsel %vm3434_vm5, %v2476_v14, %v1341_v57  ;;  %v1146_v21 = vsel %vm3260_vm2, %v1141_v18, %v1145_v34  ;;  %v3087_v35 = vld [vmem:[%s3767_s1 + $0x80] sm:$0xff]   ;;  %v1350_v42 = vsel %vm3434_vm5, %v2478_v36, %v1349_v48  ;;  %v3092_v44 = vld [vmem:[%s3767_s1 + $0x90] sm:$0xff]  }
  0x38   : > { %2782 = vmatpush3.bf16.msra.mxu1 %v3078_v30  ;;  %v3081_v30 = vld [vmem:[%s3767_s1 + $0x168] sm:$0xff]   ;;  %v346_v43 = vrot.slane %v345_v33, 4  ;;  %v1153_v16 = vrot.slane %v1151_v49, 5  ;;  %v1357_v45 = vrot.slane %v3359_v24, 5  ;;  %v1365_v53 = vrot.slane %v3401_v17, 5  ;;  %v3096_v18 = vld [vmem:[%s3767_s1 + $0xa0] sm:$0xff]  }
  0x39   : > { %2876 = vmatpush3.bf16.msra.mxu0 %v3077_v29  ;;  %2783 = vmatprep.subr.bf16.mxu1 %v3080_v6  ;;  %v1148_v29 = vshrl.u32 %v2438_v9, 16  ;;  %v1369_v24 = vrot.slane %v3409_v27, 5  ;;  %v682_v34 = vrot.slane %v3233_v15, 5  ;;  %v686_v17 = vrot.slane %v3278_v56, 5  ;;  %v650_v15 = vld [vmem:[%s3215_s14 + $0x8] sm:$0xe] }
  0x3a   : > { %2877 = vmatprep.subr.bf16.mxu0 %v3079_v54  ;;  %v351_v59 = vsel %vm3260_vm2, %v346_v43, %v350_v20  ;;  %v2477_v20 = vrot.slane %v2469_v10, 9  ;;  %v3090_v43 = vld [vmem:[%s3767_s1 + $0x88] sm:$0xff]   ;;  %v3093_v10 = vld [vmem:[%s3767_s1 + $0x190] sm:$0xff]   ;;  %v2353_v14 = vrot.slane %v650_v15, 9  ;;  %v694_v36 = vrot.slane %v3339_v0, 5  ;;  %v3106_v0 = vld [vmem:[%s3767_s1 + $0xc0] sm:$0xff]  }
  0x3b   : > { %v1150_v5 = vrot.slane %v1148_v29, 4  ;;  %v1361_v29 = vrot.slane %v3363_v26, 5  ;;  %v2343_v26 = vcombine.low %v3374_v46, %v3379_v50  ;;  %v3094_v46 = vld [vmem:[%s3767_s1 + $0x98] sm:$0xff]   ;;  %v3111_v15 = vld [vmem:[%s3767_s1 + $0x1c8] sm:$0xff]  }
  0x3c   : > { %2784 = vmatpush3.bf16.msra.mxu1 %v3080_v6  ;;  %v3084_v6 = vld [vmem:[%s3767_s1 + $0x38] sm:$0xff]   ;;  %v1346_v11 = vsel %vm3434_vm5, %v2477_v20, %v1345_v47 }
  0x3d   : > { %2878 = vmatpush3.bf16.msra.mxu0 %v3079_v54  ;;  %2785 = vmatprep.subr.bf16.mxu1 %v3082_v37  ;;  %v365_v54 = vsel %vm3260_vm2, %v360_v3, %v364_v40  ;;  %v1154_v23 = vor.u32 %v1153_v16, %v1150_v5  ;;  %v2500_v57 = vcombine.low %v1342_v32, %v1346_v11  ;;  %v649_v16 = vld [vmem:[%s3215_s14] sm:$0xe]  ;;  %v3095_v20 = vld [vmem:[%s3767_s1 + $0x198] sm:$0xff]  }
  0x3e   : > { %2879 = vmatprep.subr.bf16.mxu0 %v3081_v30  ;;  %v2331_v9 = vcombine.low %v351_v59, %v365_v54  ;;  %v2341_v40 = vcombine.low %v3270_v51, %v3275_v55  ;;  %v2342_v51 = vcombine.low %v3333_v62, %v3336_v63  ;;  %v678_v55 = vrot.slane %v3227_v13, 5  ;;  %v3091_v62 = vld [vmem:[%s3767_s1 + $0x188] sm:$0xff]   ;;  %v2473_v63 = vld [vmem:[%s3215_s14 + $0x30] sm:$0xe]  ;;  %v2475_v59 = vld [vmem:[%s3215_s14 + $0x40] sm:$0xe] }
  0x3f   : > { %v1155_v33 = vrot.slane %v1154_v23, 4  ;;  %v2472_v13 = vld [vmem:[%s3215_s14 + $0x28] sm:$0xe]  ;;  %v2481_v49 = vrot.slane %v2473_v63, 9  ;;  %v2483_v7 = vrot.slane %v2475_v59, 9  ;;  %v2352_v56 = vrot.slane %v649_v16, 9 }
  0x40   : > { %2786 = vmatpush3.bf16.msra.mxu1 %v3082_v37  ;;  %v2479_v37 = vrot.slane %v2471_v12, 9  ;;  %v2480_v48 = vrot.slane %v2472_v13, 9  ;;  %v690_v54 = vrot.slane %v3283_v60, 5  ;;  %v651_v23 = vld [vmem:[%s3215_s14 + $0x10] sm:$0xe] }
  0x41   : > { %2880 = vmatpush3.bf16.msra.mxu0 %v3081_v30  ;;  %2770 = vmatmul.mubr.bf16.gmra.mrb[4].mxu1 %v2331_v9  ;;  %v1160_v31 = vsel %vm3260_vm2, %v1155_v33, %v1159_v1  ;;  %v1362_v4 = vsel %vm3434_vm5, %v2481_v49, %v1361_v29  ;;  %v683_v9 = vsel %vm3434_vm5, %v2353_v14, %v682_v34  ;;  %v652_v60 = vld [vmem:[%s3215_s14 + $0x18] sm:$0xe]  ;;  %v2354_v25 = vrot.slane %v651_v23, 9  ;;  %v3098_v33 = vld [vmem:[%s3767_s1 + $0xa8] sm:$0xff]  }
  0x42   : > { %2881 = vmatprep.subr.bf16.mxu0 %v3083_v58  ;;  %2787 = vmatprep.subr.bf16.mxu1 %v3084_v6  ;;  %v2459_v39 = vcombine.low %v1146_v21, %v1160_v31  ;;  %v1354_v30 = vsel %vm3434_vm5, %v2479_v37, %v1353_v22  ;;  %v1358_v3 = vsel %vm3434_vm5, %v2480_v48, %v1357_v45  ;;  %v3107_v32 = vld [vmem:[%s3215_s14 + $0x10] ss:$8 sps:$4 sm:$0xff]   ;;  %v702_v29 = vrot.slane %v3382_v52, 5  ;;  %v3110_v49 = vld [vmem:[%s3767_s1 + $0xc8] sm:$0xff]  }
  0x43   : > { %2789 = vmatprep.mubr.bf16.mxu1 %v2340_v19  ;;  %v2501_v47 = vcombine.low %v1350_v42, %v1354_v30  ;;  %v2502_v27 = vcombine.low %v1358_v3, %v1362_v4  ;;  %v679_v19 = vsel %vm3434_vm5, %v2352_v56, %v678_v55  ;;  %v687_v11 = vsel %vm3434_vm5, %v2354_v25, %v686_v17  ;;  %v3101_v31 = vld [vmem:[%s3767_s1 + $0xb0] sm:$0xff]   ;;  %v3104_v37 = vld [vmem:[%s3767_s1 + $0xb8] sm:$0xff]   ;;  %v2554_v25 = vld [vmem:[%s3215_s14 + $0x28] sm:$0xf] }
  0x44   : > { %2788 = vmatpush3.bf16.msra.mxu1 %v3084_v6  ;;  %2866 = vmatmul.mubr.bf16.gmra.mrb[4].mxu0 %v2459_v39  ;;  %v1370_v6 = vsel %vm3434_vm5, %v2483_v7, %v1369_v24  ;;  %v2376_v1 = vcombine.low %v679_v19, %v683_v9  ;;  %v653_v39 = vld [vmem:[%s3215_s14 + $0x20] sm:$0xe]  ;;  %v3105_v45 = vld [vmem:[%s3767_s1 + $0x1b8] sm:$0xff]   ;;  %v3573_v24 = vld [vmem:[%s3215_s14 + $0x14] sm:$0x1] }
  0x45   : > { %2882 = vmatpush3.bf16.msra.mxu0 %v3083_v58  ;;  %2797 = vmatprep.subr.bf16.mxu1 %v3087_v35  ;;  %v2474_v58 = vld [vmem:[%s3215_s14 + $0x38] sm:$0xe]  ;;  %v2356_v42 = vrot.slane %v653_v39, 9  ;;  %v1722_v59 = vshll.u32 %v3573_v24, 16  ;;  %v3109_v7 = vld [vmem:[%s3215_s14 + $0x20] ss:$8 sps:$4 sm:$0xff]  }
  0x46   : > { %2883 = vmatprep.subr.bf16.mxu0 %v3085_v28  ;;  %2885 = vmatprep.mubr.bf16.mxu0 %v2500_v57  ;;  %v2482_v5 = vrot.slane %v2474_v58, 9  ;;  %v3099_v57 = vld [vmem:[%s3767_s1 + $0x1a8] sm:$0xff]   ;;  %v2550_v52 = vld [vmem:[%s3215_s14 + $0x18] sm:$0xf]  ;;  %v3113_v9 = vld [vmem:[%s3767_s1 + $0x1d0] sm:$0xff]  }
  0x47   : > { %v1727_v3 = vshrl.u32 %v2550_v52, 16  ;;  %v1730_v4 = vshll.u32 %v2550_v52, 16  ;;  %v3120_v56 = vld [vmem:[%s3215_s14 + $0x30] ss:$8 sps:$4 sm:$0xff]   ;;  %v3119_v52 = vld [vmem:[%s3767_s1 + $0x1e8] sm:$0xff]  }
  0x48   : > { %v1366_v50 = vsel %vm3434_vm5, %v2482_v5, %v1365_v53  ;;  %v2548_v53 = vld [vmem:[%s3215_s14 + $0x10] sm:$0xf]  ;;  %v3114_v23 = vld [vmem:[%s3767_s1 + $0xd8] sm:$0xff]  }
  0x49   : > { %2884 = vmatpush3.bf16.msra.mxu0 %v3085_v28  ;;  %2790 = vmatmul.mubr.bf16.vlgmr.msra.gmra.mrb[0].mxu1 %v2341_v40  ;;  %v2503_v22 = vcombine.low %v1366_v50, %v1370_v6  ;;  %v2355_v28 = vrot.slane %v652_v60, 9  ;;  %v654_v40 = vld [vmem:[%s3215_s14 + $0x28] sm:$0xe]  ;;  %v1716_v58 = vshll.u32 %v2548_v53, 16  ;;  %v1729_v50 = vrot.slane %v1727_v3, 4 }
  0x4a   : > { %2893 = vmatprep.subr.bf16.mxu0 %v3088_v41  ;;  %2798 = vmatpush3.bf16.msra.mxu1 %v3087_v35  ;;  %v3097_v35 = vld [vmem:[%s3767_s1 + $0x1a0] sm:$0xff]   ;;  %v2357_v30 = vrot.slane %v654_v40, 9  ;;  %v1732_v6 = vrot.slane %v1730_v4, 5 }
  0x4b   : > { %2799 = vmatprep.subr.bf16.mxu1 %v3090_v43  ;;  %2793 = vmatprep.mubr.bf16.mxu1 %v2342_v51  ;;  %v691_v12 = vsel %vm3434_vm5, %v2355_v28, %v690_v54  ;;  %v655_v51 = vld [vmem:[%s3215_s14 + $0x30] sm:$0xe]  ;;  %v1718_v16 = vrot.slane %v1716_v58, 5  ;;  %v1724_v54 = vrot.slane %v1722_v59, 5 }
  0x4c   : > { %2886 = vmatmul.mubr.bf16.vlgmr.msra.gmra.mrb[0].mxu0 %v2501_v47  ;;  %v2377_v21 = vcombine.low %v687_v11, %v691_v12  ;;  %v706_v47 = vrot.slane %v3391_v61, 5  ;;  %v2358_v63 = vrot.slane %v655_v51, 9  ;;  %v3577_v61 = vld [vmem:[%s3215_s14 + $0x1c] sm:$0x1]  ;;  %v3122_v11 = vld [vmem:[%s3215_s14 + $0x40] ss:$8 sps:$4 sm:$0xff]  }
  0x4d   : > { %2894 = vmatpush3.bf16.msra.mxu0 %v3088_v41  ;;  %2889 = vmatprep.mubr.bf16.mxu0 %v2502_v27  ;;  %v698_v41 = vrot.slane %v3342_v2, 5  ;;  %v695_v2 = vsel %vm3434_vm5, %v2356_v42, %v694_v36  ;;  %v1736_v5 = vshll.u32 %v3577_v61, 16  ;;  %v2556_v12 = vld [vmem:[%s3215_s14 + $0x30] sm:$0xf]  ;;  %v1758_v36 = vshll.u32 %v2554_v25, 16 }
  0x4e   : > { %2800 = vmatpush3.bf16.msra.mxu1 %v3090_v43  ;;  %2895 = vmatprep.subr.bf16.mxu0 %v3091_v62  ;;  %v3102_v43 = vld [vmem:[%s3767_s1 + $0x1b0] sm:$0xff]   ;;  %v703_v34 = vsel %vm3434_vm5, %v2358_v63, %v702_v29  ;;  %v1769_v40 = vshrl.u32 %v2556_v12, 16  ;;  %v3622_v51 = vld [vmem:[%s3215_s14 + $0x24] sm:$0x1] }
  0x4f   : > { %2801 = vmatprep.subr.bf16.mxu1 %v3092_v44  ;;  %v699_v55 = vsel %vm3434_vm5, %v2357_v30, %v698_v41  ;;  %v1738_v19 = vrot.slane %v1736_v5, 5  ;;  %v1772_v41 = vshll.u32 %v2556_v12, 16  ;;  %v1760_v29 = vrot.slane %v1758_v36, 5  ;;  %v2562_v5 = vld [vmem:[%s3215_s14 + $0x48] sm:$0xf]  ;;  %v3125_v12 = vld [vmem:[%s3767_s1 + $0x1f8] sm:$0xff]  }
  0x50   : > { %v2378_v13 = vcombine.low %v695_v2, %v699_v55  ;;  %v3625_v2 = vld [vmem:[%s3215_s14 + $0x2c] sm:$0x1]  ;;  %v1750_v58 = vshll.u32 %v3622_v51, 16 }
  0x51   : > { %2794 = vmatmul.mubr.bf16.gmra.mrb[4].mxu1 %v2343_v26  ;;  %2896 = vmatpush3.bf16.msra.mxu0 %v3091_v62  ;;  %v3108_v62 = vld [vmem:[%s3767_s1 + $0x1c0] sm:$0xff]   ;;  %v1713_v26 = vshrl.u32 %v2548_v53, 16  ;;  %v1774_v63 = vrot.slane %v1772_v41, 5  ;;  %v1764_v59 = vshll.u32 %v3625_v2, 16 }
  0x52   : > { %2802 = vmatpush3.bf16.msra.mxu1 %v3092_v44  ;;  %2897 = vmatprep.subr.bf16.mxu0 %v3093_v10  ;;  %v656_v44 = vld [vmem:[%s3215_s14 + $0x38] sm:$0xe]  ;;  %v2560_v53 = vld [vmem:[%s3215_s14 + $0x40] sm:$0xf] }
  0x53   : > { %2803 = vmatprep.subr.bf16.mxu1 %v3094_v46  ;;  %2813 = vmatprep.mubr.bf16.mxu1 %v2376_v1  ;;  %v2359_v48 = vrot.slane %v656_v44, 9  ;;  %v1715_v27 = vrot.slane %v1713_v26, 4  ;;  %v2552_v1 = vld [vmem:[%s3215_s14 + $0x20] sm:$0xf]  ;;  %v3121_v26 = vld [vmem:[%s3767_s1 + $0xf0] sm:$0xff]  }
  0x54   : > { %2890 = vmatmul.mubr.bf16.gmra.mrb[4].mxu0 %v2503_v22 }
  0x55   : > { %2898 = vmatpush3.bf16.msra.mxu0 %v3093_v10  ;;  %2909 = vmatprep.mubr.bf16.mxu0 %v3107_v32  ;;  %v707_v17 = vsel %vm3434_vm5, %v2359_v48, %v706_v47  ;;  %v1719_v10 = vor.u32 %v1718_v16, %v1715_v27  ;;  %v3628_v47 = vld [vmem:[%s3215_s14 + $0x34] sm:$0x1]  ;;  %v1800_v27 = vshll.u32 %v2560_v53, 16 }
  0x56   : > { %2804 = vmatpush3.bf16.msra.mxu1 %v3094_v46  ;;  %2899 = vmatprep.subr.bf16.mxu0 %v3095_v20  ;;  %v3112_v46 = vld [vmem:[%s3767_s1 + $0xd0] sm:$0xff]   ;;  %v2379_v14 = vcombine.low %v703_v34, %v707_v17  ;;  %v1778_v3 = vshll.u32 %v3628_v47, 16  ;;  %v1797_v17 = vshrl.u32 %v2560_v53, 16  ;;  %v2593_v53 = vld [vmem:[%s3215_s14 + $0x18] sm:$0xe] }
  0x57   : > { %2805 = vmatprep.subr.bf16.mxu1 %v3096_v18  ;;  %v1720_v22 = vrot.slane %v1719_v10, 4 }
  0x59   : > { %2900 = vmatpush3.bf16.msra.mxu0 %v3095_v20  ;;  %v3126_v20 = vld [vmem:[%s3215_s14 + $0x8] ss:$8 sps:$4 sm:$0xff]   ;;  %v1725_v28 = vsel %vm3260_vm2, %v1720_v22, %v1724_v54 }
  0x5a   : > { %2806 = vmatpush3.bf16.msra.mxu1 %v3096_v18  ;;  %2901 = vmatprep.subr.bf16.mxu0 %v3097_v35  ;;  %v1733_v18 = vor.u32 %v1732_v6, %v1729_v50  ;;  %v1811_v50 = vshrl.u32 %v2562_v5, 16  ;;  %v1814_v6 = vshll.u32 %v2562_v5, 16  ;;  %v2601_v5 = vrot.slane %v2593_v53, 9 }
  0x5b   : > { %2807 = vmatprep.subr.bf16.mxu1 %v3098_v33 }
  0x5c   : > { %v1734_v60 = vrot.slane %v1733_v18, 4  ;;  %v1766_v18 = vrot.slane %v1764_v59, 5  ;;  %v3131_v59 = vld [vmem:[%s3215_s14 + $0x38] ss:$8 sps:$4 sm:$0xff]  }
  0x5d   : > { %2902 = vmatpush3.bf16.msra.mxu0 %v3097_v35  ;;  %v1741_v35 = vshrl.u32 %v2552_v1, 16 }
  0x5e   : > { %2808 = vmatpush3.bf16.msra.mxu1 %v3098_v33  ;;  %2903 = vmatprep.subr.bf16.mxu0 %v3099_v57  ;;  %v1739_v32 = vsel %vm3260_vm2, %v1734_v60, %v1738_v19  ;;  %v3116_v33 = vld [vmem:[%s3767_s1 + $0xe0] sm:$0xff]   ;;  %v3655_v60 = vld [vmem:[%s3215_s14 + $0x4c] sm:$0x1] }
  0x5f   : > { %2809 = vmatprep.subr.bf16.mxu1 %v3101_v31  ;;  %v2580_v39 = vcombine.low %v1725_v28, %v1739_v32  ;;  %v1743_v55 = vrot.slane %v1741_v35, 4  ;;  %v1813_v28 = vrot.slane %v1811_v50, 4  ;;  %v1816_v32 = vrot.slane %v1814_v6, 5  ;;  %v3127_v35 = vld [vmem:[%s3215_s14 + $0x18] ss:$8 sps:$4 sm:$0xff]   ;;  %v3135_v6 = vld [vmem:[%s3767_s1 + $0x228] sm:$0xff]  }
  0x61   : > { %2904 = vmatpush3.bf16.msra.mxu0 %v3099_v57  ;;  %v1755_v57 = vshrl.u32 %v2554_v25, 16  ;;  %v1802_v25 = vrot.slane %v1800_v27, 5 }
  0x62   : > { %2810 = vmatpush3.bf16.msra.mxu1 %v3101_v31  ;;  %2905 = vmatprep.subr.bf16.mxu0 %v3102_v43  ;;  %v1744_v31 = vshll.u32 %v2552_v1, 16  ;;  %v1799_v1 = vrot.slane %v1797_v17, 4 }
  0x63   : > { %2811 = vmatprep.subr.bf16.mxu1 %v3104_v37 }
  0x64   : > { %v1746_v44 = vrot.slane %v1744_v31, 5 }
  0x65   : > { %2906 = vmatpush3.bf16.msra.mxu0 %v3102_v43  ;;  %v3117_v43 = vld [vmem:[%s3767_s1 + $0x1e0] sm:$0xff]  }
  0x66   : > { %2812 = vmatpush3.bf16.msra.mxu1 %v3104_v37  ;;  %2907 = vmatprep.subr.bf16.mxu0 %v3105_v45  ;;  %v3115_v37 = vld [vmem:[%s3767_s1 + $0x1d8] sm:$0xff]  }
  0x67   : > { %2821 = vmatprep.subr.bf16.mxu1 %v3106_v0 }
  0x69   : > { %2814 = vmatmul.mubr.bf16.vlgmr.msra.gmra.mrb[0].mxu1 %v2377_v21  ;;  %2908 = vmatpush3.bf16.msra.mxu0 %v3105_v45  ;;  %v2558_v21 = vld [vmem:[%s3215_s14 + $0x38] sm:$0xf]  ;;  %v1757_v45 = vrot.slane %v1755_v57, 4 }
  0x6a   : > { %2822 = vmatpush3.bf16.msra.mxu1 %v3106_v0  ;;  %2817 = vmatprep.mubr.bf16.mxu1 %v2378_v13  ;;  %v1783_v42 = vshrl.u32 %v2558_v21, 16  ;;  %v1786_v30 = vshll.u32 %v2558_v21, 16  ;;  %v3118_v0 = vld [vmem:[%s3767_s1 + $0xe8] sm:$0xff]   ;;  %v1771_v13 = vrot.slane %v1769_v40, 4  ;;  %v2596_v21 = vld [vmem:[%s3215_s14 + $0x30] sm:$0xe] }
  0x6b   : > { %2823 = vmatprep.subr.bf16.mxu1 %v3110_v49  ;;  %2917 = vmatprep.subr.bf16.mxu0 %v3108_v62  ;;  %v1761_v34 = vor.u32 %v1760_v29, %v1757_v45 }
  0x6c   : > { %2910 = vmatmul.mubr.bf16.vlgmr.msra.gmra.mrb[0].mxu0 %v3109_v7  ;;  %v1785_v48 = vrot.slane %v1783_v42, 4  ;;  %v1747_v7 = vor.u32 %v1746_v44, %v1743_v55  ;;  %v1775_v16 = vor.u32 %v1774_v63, %v1771_v13  ;;  %v1803_v42 = vor.u32 %v1802_v25, %v1799_v1 }
  0x6d   : > { %2918 = vmatpush3.bf16.msra.mxu0 %v3108_v62  ;;  %2913 = vmatprep.mubr.bf16.mxu0 %v3120_v56  ;;  %v3631_v62 = vld [vmem:[%s3215_s14 + $0x3c] sm:$0x1]  ;;  %v3123_v56 = vld [vmem:[%s3767_s1 + $0x1f0] sm:$0xff]   ;;  %v1762_v54 = vrot.slane %v1761_v34, 4  ;;  %v2020_v55 = vrot.slane %v3628_v47, 5  ;;  %v2012_v25 = vrot.slane %v3622_v51, 5 }
  0x6e   : > { %2824 = vmatpush3.bf16.msra.mxu1 %v3110_v49  ;;  %2919 = vmatprep.subr.bf16.mxu0 %v3111_v15  ;;  %v1788_v49 = vrot.slane %v1786_v30, 5  ;;  %v1792_v4 = vshll.u32 %v3631_v62, 16  ;;  %v1748_v10 = vrot.slane %v1747_v7, 4  ;;  %v1776_v19 = vrot.slane %v1775_v16, 4  ;;  %v3133_v16 = vld [vmem:[%s3767_s1 + $0x218] sm:$0xff]  }
  0x6f   : > { %2825 = vmatprep.subr.bf16.mxu1 %v3112_v46  ;;  %v1767_v57 = vsel %vm3260_vm2, %v1762_v54, %v1766_v18  ;;  %v1817_v30 = vor.u32 %v1816_v32, %v1813_v28  ;;  %v2024_v45 = vrot.slane %v3631_v62, 5  ;;  %v2008_v7 = vrot.slane %v3577_v61, 5 }
  0x70   : > { %v2032_v54 = vrot.slane %v3655_v60, 5  ;;  %v2016_v32 = vrot.slane %v3625_v2, 5 }
  0x71   : > { %2818 = vmatmul.mubr.bf16.gmra.mrb[4].mxu1 %v2379_v14  ;;  %2920 = vmatpush3.bf16.msra.mxu0 %v3111_v15  ;;  %v3124_v15 = vld [vmem:[%s3767_s1 + $0xf8] sm:$0xff]   ;;  %v1752_v14 = vrot.slane %v1750_v58, 5  ;;  %v3132_v58 = vld [vmem:[%s3767_s1 + $0x210] sm:$0xff]   ;;  %v2009_v61 = vsel %vm3434_vm5, %v2601_v5, %v2008_v7 }
  0x72   : > { %2826 = vmatpush3.bf16.msra.mxu1 %v3112_v46  ;;  %2837 = vmatprep.mubr.bf16.mxu1 %v3126_v20  ;;  %v1789_v46 = vor.u32 %v1788_v49, %v1785_v48  ;;  %v1780_v20 = vrot.slane %v1778_v3, 5  ;;  %v2592_v49 = vld [vmem:[%s3215_s14 + $0x10] sm:$0xe] }
  0x73   : > { %2827 = vmatprep.subr.bf16.mxu1 %v3114_v23  ;;  %2921 = vmatprep.subr.bf16.mxu0 %v3113_v9  ;;  %v1753_v31 = vsel %vm3260_vm2, %v1748_v10, %v1752_v14  ;;  %v2600_v3 = vrot.slane %v2592_v49, 9  ;;  %v2599_v10 = vld [vmem:[%s3215_s14 + $0x48] sm:$0xe] }
  0x74   : > { %2914 = vmatmul.mubr.bf16.gmra.mrb[4].mxu0 %v3122_v11  ;;  %v1790_v22 = vrot.slane %v1789_v46, 4  ;;  %v3128_v11 = vld [vmem:[%s3767_s1 + $0x200] sm:$0xff]   ;;  %v1781_v40 = vsel %vm3260_vm2, %v1776_v19, %v1780_v20  ;;  %v2581_v29 = vcombine.low %v1753_v31, %v1767_v57  ;;  %v2607_v19 = vrot.slane %v2599_v10, 9  ;;  %v3137_v20 = vld [vmem:[%s3767_s1 + $0x238] sm:$0xff]  }
  0x75   : > { %2922 = vmatpush3.bf16.msra.mxu0 %v3113_v9  ;;  %2933 = vmatprep.mubr.bf16.mxu0 %v2580_v39  ;;  %v1794_v9 = vrot.slane %v1792_v4, 5  ;;  %v3130_v39 = vld [vmem:[%s3215_s14 + $0x28] ss:$8 sps:$4 sm:$0xff]   ;;  %v2004_v4 = vrot.slane %v3573_v24, 5 }
  0x76   : > { %2828 = vmatpush3.bf16.msra.mxu1 %v3114_v23  ;;  %2923 = vmatprep.subr.bf16.mxu0 %v3115_v37  ;;  %v3652_v23 = vld [vmem:[%s3215_s14 + $0x44] sm:$0x1] }
  0x77   : > { %2829 = vmatprep.subr.bf16.mxu1 %v3116_v33  ;;  %v1806_v36 = vshll.u32 %v3652_v23, 16  ;;  %v1795_v41 = vsel %vm3260_vm2, %v1790_v22, %v1794_v9  ;;  %v2005_v24 = vsel %vm3434_vm5, %v2600_v3, %v2004_v4  ;;  %v2028_v14 = vrot.slane %v3652_v23, 5  ;;  %v2594_v22 = vld [vmem:[%s3215_s14 + $0x20] sm:$0xe]  ;;  %v2595_v9 = vld [vmem:[%s3215_s14 + $0x28] sm:$0xe] }
  0x78   : > { %v2582_v13 = vcombine.low %v1781_v40, %v1795_v41  ;;  %v2624_v50 = vcombine.low %v2005_v24, %v2009_v61  ;;  %v2033_v23 = vsel %vm3434_vm5, %v2607_v19, %v2032_v54  ;;  %v2603_v28 = vrot.slane %v2595_v9, 9 }
  0x79   : > { %2924 = vmatpush3.bf16.msra.mxu0 %v3115_v37  ;;  %v1820_v37 = vshll.u32 %v3655_v60, 16  ;;  %v1808_v63 = vrot.slane %v1806_v36, 5  ;;  %v2602_v60 = vrot.slane %v2594_v22, 9 }
  0x7a   : > { %2830 = vmatpush3.bf16.msra.mxu1 %v3116_v33  ;;  %2925 = vmatprep.subr.bf16.mxu0 %v3117_v43  ;;  %v2597_v33 = vld [vmem:[%s3215_s14 + $0x38] sm:$0xe] }
  0x7b   : > { %2831 = vmatprep.subr.bf16.mxu1 %v3118_v0  ;;  %v2605_v44 = vrot.slane %v2597_v33, 9  ;;  %v1822_v48 = vrot.slane %v1820_v37, 5 }
  0x7d   : > { %2926 = vmatpush3.bf16.msra.mxu0 %v3117_v43  ;;  %v3129_v43 = vld [vmem:[%s3767_s1 + $0x208] sm:$0xff]   ;;  %v2025_v62 = vsel %vm3434_vm5, %v2605_v44, %v2024_v45  ;;  %v2636_v44 = vld [vmem:[%s3768_s2] ss:$0 sm:$0xff] }
  0x7e   : > { %2832 = vmatpush3.bf16.msra.mxu1 %v3118_v0  ;;  %2927 = vmatprep.subr.bf16.mxu0 %v3119_v52  ;;  %v2604_v0 = vrot.slane %v2596_v21, 9  ;;  %v2017_v21 = vsel %vm3434_vm5, %v2603_v28, %v2016_v32 }
  0x7f   : > { %2833 = vmatprep.subr.bf16.mxu1 %v3121_v26 }
  0x80   : > { %v2021_v47 = vsel %vm3434_vm5, %v2604_v0, %v2020_v55 }
  0x81   : > { %2928 = vmatpush3.bf16.msra.mxu0 %v3119_v52  ;;  %v1804_v52 = vrot.slane %v1803_v42, 4  ;;  %v2626_v34 = vcombine.low %v2021_v47, %v2025_v62 }
  0x82   : > { %2834 = vmatpush3.bf16.msra.mxu1 %v3121_v26  ;;  %2929 = vmatprep.subr.bf16.mxu0 %v3123_v56  ;;  %v1818_v26 = vrot.slane %v1817_v30, 4 }
  0x83   : > { %2835 = vmatprep.subr.bf16.mxu1 %v3124_v15  ;;  %v1809_v17 = vsel %vm3260_vm2, %v1804_v52, %v1808_v63 }
  0x84   : > { %v1823_v27 = vsel %vm3260_vm2, %v1818_v26, %v1822_v48 }
  0x85   : > { %2930 = vmatpush3.bf16.msra.mxu0 %v3123_v56  ;;  %v2583_v46 = vcombine.low %v1809_v17, %v1823_v27  ;;  %v2598_v56 = vld [vmem:[%s3215_s14 + $0x40] sm:$0xe]  ;;  %s2639_s14 = sshll.u32 %s3776_s16, 6 }
  0x86   : > { %2836 = vmatpush3.bf16.msra.mxu1 %v3124_v15  ;;  %2931 = vmatprep.subr.bf16.mxu0 %v3125_v12  ;;  %v3136_v15 = vld [vmem:[%s3767_s1 + $0x230] sm:$0xff]   ;;  %v2606_v18 = vrot.slane %v2598_v56, 9  ;;  %s3737_s28 = scalar_lea.vmem %s3769_s3, %s2639_s14  ;;  %s3749_s6 = scalar_lea.vmem %s3770_s4, %s2639_s14 }
  0x87   : > { %2965 = vmatprep.subr.bf16.mxu1 %v3128_v11  ;;  %v2209_v63 = vld [vmem:[%s3737_s28 + $0x30] sm:$0xff]  ;;  %v2207_v52 = vld [vmem:[%s3737_s28 + $0x20] sm:$0xff]  ;;  %v2208_v7 = vld [vmem:[%s3737_s28 + $0x28] sm:$0xff] }
  0x88   : > { %v2029_v1 = vsel %vm3434_vm5, %v2606_v18, %v2028_v14  ;;  %v2205_v61 = vld [vmem:[%s3737_s28 + $0x10] sm:$0xff]  ;;  %v2203_v56 = vld [vmem:[%s3737_s28] sm:$0xff]  ;;  %v2206_v54 = vld [vmem:[%s3737_s28 + $0x18] sm:$0xff] }
  0x89   : > { %2838 = vmatmul.mubr.bf16.vlgmr.msra.gmra.mrb[0].mxu1 %v3127_v35  ;;  %2932 = vmatpush3.bf16.msra.mxu0 %v3125_v12  ;;  %v2013_v12 = vsel %vm3434_vm5, %v2602_v60, %v2012_v25 }
  0x8a   : > { %2973 = vmatpush3.bf16.msra.mxu1 %v3128_v11  ;;  %2841 = vmatprep.mubr.bf16.mxu1 %v3130_v39  ;;  %v2625_v33 = vcombine.low %v2013_v12, %v2017_v21 }
  0x8b   : > { %2966 = vmatprep.subr.bf16.mxu1 %v3129_v43  ;;  %2941 = vmatprep.subr.bf16.mxu0 %v3128_v11 }
  0x8c   : > { %2934 = vmatmul.mubr.bf16.vlgmr.msra.gmra.mrb[0].mxu0 %v2581_v29 }
  0x8d   : > { %2942 = vmatpush3.bf16.msra.mxu0 %v3128_v11  ;;  %2937 = vmatprep.mubr.bf16.mxu0 %v2582_v13  ;;  %v2627_v11 = vcombine.low %v2029_v1, %v2033_v23 }
  0x8e   : > { %2974 = vmatpush3.bf16.msra.mxu1 %v3129_v43  ;;  %2943 = vmatprep.subr.bf16.mxu0 %v3129_v43 }
  0x8f   : > { %2967 = vmatprep.subr.bf16.mxu1 %v3132_v58 }
  0x91   : > { %2842 = vmatmul.mubr.bf16.gmra.mrb[4].mxu1 %v3131_v59  ;;  %2944 = vmatpush3.bf16.msra.mxu0 %v3129_v43 }
  0x92   : > { %2975 = vmatpush3.bf16.msra.mxu1 %v3132_v58  ;;  %2961 = vmatprep.mubr.bf16.mxu1 %v2626_v34 }
  0x93   : > { %2968 = vmatprep.subr.bf16.mxu1 %v3133_v16  ;;  %2945 = vmatprep.subr.bf16.mxu0 %v3132_v58 }
  0x94   : > { %2938 = vmatmul.mubr.bf16.gmra.mrb[4].mxu0 %v2583_v46 }
  0x95   : > { %2946 = vmatpush3.bf16.msra.mxu0 %v3132_v58  ;;  %2957 = vmatprep.mubr.bf16.mxu0 %v2624_v50  ;;  %v2210_v58 = vld [vmem:[%s3737_s28 + $0x38] sm:$0xff] }
  0x96   : > { %2976 = vmatpush3.bf16.msra.mxu1 %v3133_v16  ;;  %2947 = vmatprep.subr.bf16.mxu0 %v3133_v16 }
  0x97   : > { %2969 = vmatprep.subr.bf16.mxu1 %v3134_v38 }
  0x99   : > { %2948 = vmatpush3.bf16.msra.mxu0 %v3133_v16  ;;  %v2204_v16 = vld [vmem:[%s3737_s28 + $0x8] sm:$0xff] }
  0x9a   : > { %2977 = vmatpush3.bf16.msra.mxu1 %v3134_v38  ;;  %2949 = vmatprep.subr.bf16.mxu0 %v3134_v38 }
  0x9b   : > { %2970 = vmatprep.subr.bf16.mxu1 %v3135_v6 }
  0x9d   : > { %2950 = vmatpush3.bf16.msra.mxu0 %v3134_v38 }
  0x9e   : > { %2978 = vmatpush3.bf16.msra.mxu1 %v3135_v6  ;;  %2951 = vmatprep.subr.bf16.mxu0 %v3135_v6 }
  0x9f   : > { %2971 = vmatprep.subr.bf16.mxu1 %v3136_v15 }
  0xa1   : > { %2952 = vmatpush3.bf16.msra.mxu0 %v3135_v6 }
  0xa2   : > { %2979 = vmatpush3.bf16.msra.mxu1 %v3136_v15  ;;  %2953 = vmatprep.subr.bf16.mxu0 %v3136_v15 }
  0xa3   : > { %2972 = vmatprep.subr.bf16.mxu1 %v3137_v20 }
  0xa5   : > { %2954 = vmatpush3.bf16.msra.mxu0 %v3136_v15 }
  0xa6   : > { %2980 = vmatpush3.bf16.msra.mxu1 %v3137_v20  ;;  %2955 = vmatprep.subr.bf16.mxu0 %v3137_v20 }
  0xa9   : > { %2962 = vmatmul.mubr.bf16.vlgmr.msra.gmra.mrb[8].mxu1 %v2627_v11  ;;  %2956 = vmatpush3.bf16.msra.mxu0 %v3137_v20 }
  0xac   : > { %2958 = vmatmul.mubr.bf16.vlgmr.msra.gmra.mrb[0].mxu0 %v2625_v33 }
 0x15c   : > { %v2839_v35 = vpop.f32.mrb[0].mxu1 }
 0x15d   : > { %v994_v51 = vpop.f32.mrb[1].mxu1 }
 0x15e   : > { %v2840_v31 = vpop.f32.mrb[2].mxu1 }
 0x15f   : > { %v997_v2 = vpop.f32.mrb[3].mxu1 }
 0x164   : > { %v2843_v57 = vpop.f32.mrb[4].mxu1 }
 0x165   : > { %v1010_v36 = vpop.f32.mrb[5].mxu1 }
 0x166   : > { %v2844_v37 = vpop.f32.mrb[6].mxu1 }
 0x167   : > { %v1013_v39 = vpop.f32.mrb[7].mxu1  ;;  %v2939_v40 = vpop.f32.mrb[4].mxu0 }
 0x168   : > { %v2985_v41 = vadd.f32 %v2939_v40, %v2843_v57  ;;  %v1955_v42 = vpop.f32.mrb[5].mxu0 }
 0x169   : > { %v2987_v30 = vadd.f32 %v1955_v42, %v1010_v36  ;;  %v2940_v8 = vpop.f32.mrb[6].mxu0 }
 0x16a   : > { %v2989_v43 = vadd.f32 %v2940_v8, %v2844_v37  ;;  %v1958_v0 = vpop.f32.mrb[7].mxu0 }
 0x16b   : > { %v2991_v55 = vadd.f32 %v1958_v0, %v1013_v39 }
 0x17c   : > { %v2963_v45 = vpop.f32.mrb[8].mxu1 }
 0x17d   : > { %v2986_v29 = vadd.f32 %v2985_v41, %v2963_v45  ;;  %v2165_v13 = vpop.f32.mrb[9].mxu1 }
 0x17e   : > { %v2988_v48 = vadd.f32 %v2987_v30, %v2165_v13  ;;  %v2964_v49 = vpop.f32.mrb[10].mxu1 }
 0x17f   : > { %v2201_v53 = vadd.f32 %v2986_v29, %v2636_v44  ;;  %v2990_v26 = vadd.f32 %v2989_v43, %v2964_v49  ;;  %v2168_v47 = vpop.f32.mrb[11].mxu1  ;;  %v2959_v3 = vpop.f32.mrb[0].mxu0 }
 0x180   : > { %v2199_v62 = vadd.f32 %v2988_v48, %v2636_v44  ;;  %v2992_v59 = vadd.f32 %v2991_v55, %v2168_v47  ;;  %v2981_v34 = vadd.f32 %v2959_v3, %v2839_v35  ;;  %v2149_v17 = vpop.f32.mrb[1].mxu0 }
 0x181   : > { %v2217_v4 = vadd.f32 %v2209_v63, %v2201_v53  ;;  %v2202_v5 = vadd.f32 %v2990_v26, %v2636_v44  ;;  %v2982_v38 = vadd.f32 %v2149_v17, %v994_v51  ;;  %v2960_v50 = vpop.f32.mrb[2].mxu0 }
 0x182   : > { %v2215_v27 = vadd.f32 %v2207_v52, %v2199_v62  ;;  %v2200_v24 = vadd.f32 %v2992_v59, %v2636_v44  ;;  %v2197_v15 = vadd.f32 %v2981_v34, %v2636_v44  ;;  %v2983_v14 = vadd.f32 %v2960_v50, %v2840_v31  ;;  %v2152_v18 = vpop.f32.mrb[3].mxu0 }
 0x183   : > { %v2225_v46 = vmax.f32 %v2217_v4, 0.0  ;;  %v2218_v6 = vadd.f32 %v2210_v58, %v2202_v5  ;;  %v2195_v20 = vadd.f32 %v2982_v38, %v2636_v44  ;;  %v2984_v9 = vadd.f32 %v2152_v18, %v997_v2 }
 0x184   : > { %v2223_v10 = vmax.f32 %v2215_v27, 0.0  ;;  %v2216_v19 = vadd.f32 %v2208_v7, %v2200_v24  ;;  %v2213_v1 = vadd.f32 %v2205_v61, %v2197_v15  ;;  %v2198_v23 = vadd.f32 %v2983_v14, %v2636_v44 }
 0x185   : > { %v2226_v22 = vmax.f32 %v2218_v6, 0.0  ;;  %2233 = vst [vmem:[%s3749_s6 + $0x30] sm:$0xff] %v2225_v46  ;;  %v2211_v25 = vadd.f32 %v2203_v56, %v2195_v20  ;;  %v2196_v28 = vadd.f32 %v2984_v9, %v2636_v44 }
 0x186   : > { %v2224_v60 = vmax.f32 %v2216_v19, 0.0  ;;  %2231 = vst [vmem:[%s3749_s6 + $0x20] sm:$0xff] %v2223_v10  ;;  %v2221_v32 = vmax.f32 %v2213_v1, 0.0  ;;  %v2214_v11 = vadd.f32 %v2206_v54, %v2198_v23 }
 0x187   : > { %2234 = vst [vmem:[%s3749_s6 + $0x38] sm:$0xff] %v2226_v22  ;;  %v2219_v12 = vmax.f32 %v2211_v25, 0.0  ;;  %v2212_v21 = vadd.f32 %v2204_v16, %v2196_v28 }
 0x188   : > { %2232 = vst [vmem:[%s3749_s6 + $0x28] sm:$0xff] %v2224_v60  ;;  %v2222_v33 = vmax.f32 %v2214_v11, 0.0  ;;  %2229 = vst [vmem:[%s3749_s6 + $0x10] sm:$0xff] %v2221_v32 }
 0x189   : > { %v2220_v35 = vmax.f32 %v2212_v21, 0.0  ;;  %2227 = vst [vmem:[%s3749_s6] sm:$0xff] %v2219_v12 }
 0x18a   : > { %2230 = vst [vmem:[%s3749_s6 + $0x18] sm:$0xff] %v2222_v33 }
 0x18b   : > { %2228 = vst [vmem:[%s3749_s6 + $0x8] sm:$0xff] %v2220_v35 }
 0x18c PF: > { %s14_s15 = sadd.s32 1, %s3144_s15  }
 0x18d   : > { %p11_p4 = scmp.ge.s32.totalorder %s14_s15, 4  }
 0x18f   :  { %13 = sbr.rel (!%p11_p4) target bundleno = 1 (0x1), region = 79 }

</bundles_post_ra>
